<compile_context>
chip_gen: v5e
topology: v5e:2x2
jax: 0.10.0
libtpu: 0.0.40
codegen_flags: <defaults>
</compile_context>

<pallas_src>
import jax
import jax.numpy as jnp
from jax.experimental import pallas as pl
from jax.experimental.pallas import tpu as pltpu

IN_DIM = 7
N_H1, N_H2, N_H3, N_H4 = 128, 256, 512, 1024
OUT_PAD = 128                 # lane-dense padded output width (>= IN_DIM + 1)
TM_MAX = 128                  # batch tile
LEAKY_SLOPE = 0.01            # PyTorch nn.LeakyReLU default


def _round_up(x, m):
    return ((x + m - 1) // m) * m


def _leaky_relu(x):
    return jnp.where(x > 0, x, LEAKY_SLOPE * x)


def _generator_kernel(keep_ref,                      # scalar prefetch (SMEM)
                      x_ref, xo_ref,
                      w1_ref, b1_ref, w2_ref, b2_ref,
                      w3_ref, b3_ref, w4_ref, b4_ref,
                      out_ref):
    x = x_ref[...]                                   # (TM, 1024) f32

    # Fused NaN detection on the raw input (replaces the host-side reduction).
    # 1.0 in a row => that row of x contained a NaN.
    row_nan = jnp.max(
        jnp.where(jnp.isnan(x), 1.0, 0.0).astype(jnp.float32),
        axis=1, keepdims=True)                       # (TM, 1)

    def layer(h_f32, w_ref, b_ref):
        # bf16 x bf16 on the MXU, f32 accumulate; bias add in f32.
        acc = jnp.dot(h_f32.astype(jnp.bfloat16), w_ref[...],
                      preferred_element_type=jnp.float32)
        return acc + b_ref[...]

    h = _leaky_relu(layer(x, w1_ref, b1_ref))        # (TM, 512)  f32
    h = _leaky_relu(layer(h, w2_ref, b2_ref))        # (TM, 256)  f32
    h = _leaky_relu(layer(h, w3_ref, b3_ref))        # (TM, 128)  f32
    y = layer(h, w4_ref, b4_ref)                     # (TM, 128)  f32; cols >= 7 are 0

    # Overwrite first `keep_cols` columns with x_the_other (keep_cols < IN_DIM,
    # so the mask never touches the padded lanes).
    keep = keep_ref[0]
    col = jax.lax.broadcasted_iota(jnp.int32, y.shape, 1)
    y = jnp.where(col < keep, xo_ref[...], y)

    # Stash the per-row NaN flag in the otherwise-unused column IN_DIM.
    y = jnp.where(col == IN_DIM, row_nan, y)

    out_ref[...] = y


def _tile_map(i, keep_ref):   # batch-tiled operands
    return (i, 0)


def _const_map(i, keep_ref):  # weights/biases resident across grid steps
    return (0, 0)


def prepare_params(params):
    """Cast weights to bf16 and pad layer-4 to a lane-dense (128, 128)."""
    w1, b1, w2, b2, w3, b3, w4, b4 = params
    w4p = jnp.zeros((N_H1, OUT_PAD), jnp.float32).at[:, :IN_DIM].set(w4)
    b4p = jnp.zeros((1, OUT_PAD), jnp.float32).at[:, :IN_DIM].set(b4)
    return (w1.astype(jnp.bfloat16), b1.astype(jnp.float32),
            w2.astype(jnp.bfloat16), b2.astype(jnp.float32),
            w3.astype(jnp.bfloat16), b3.astype(jnp.float32),
            w4p.astype(jnp.bfloat16), b4p)


def generator_tabular_3_forward(prepared_params, x, x_the_other,
                                Missing_item, batch_size, check_nan=True):
    """Reproduces Generator_tabular_3.forward.

    `prepared_params` must come from prepare_params(); `check_nan=True` does
    one host check after the kernel (set False when running under jax.jit)."""
    B, feat = x.shape
    assert feat == N_H4, "expected input feature dim 1024"

    keep_cols = 0 if Missing_item == IN_DIM else IN_DIM - Missing_item
    keep = jnp.full((1,), keep_cols, jnp.int32)

    TM = min(TM_MAX, _round_up(B, 8))
    B_pad = _round_up(B, TM)
    num_tiles = B_pad // TM

    x_pad = x if B_pad == B else jnp.pad(x, ((0, B_pad - B), (0, 0)))
    xo_pad = jnp.zeros((B_pad, OUT_PAD), jnp.float32)
    xo_pad = xo_pad.at[:B, :IN_DIM].set(x_the_other[:, :IN_DIM])

    grid_spec = pltpu.PrefetchScalarGridSpec(
        num_scalar_prefetch=1,
        grid=(num_tiles,),
        in_specs=[
            pl.BlockSpec((TM, N_H4), _tile_map),        # x
            pl.BlockSpec((TM, OUT_PAD), _tile_map),     # x_the_other (padded)
            pl.BlockSpec((N_H4, N_H3), _const_map),     # W1 (bf16)
            pl.BlockSpec((1, N_H3), _const_map),        # b1
            pl.BlockSpec((N_H3, N_H2), _const_map),     # W2
            pl.BlockSpec((1, N_H2), _const_map),        # b2
            pl.BlockSpec((N_H2, N_H1), _const_map),     # W3
            pl.BlockSpec((1, N_H1), _const_map),        # b3
            pl.BlockSpec((N_H1, OUT_PAD), _const_map),  # W4 (padded)
            pl.BlockSpec((1, OUT_PAD), _const_map),     # b4 (padded)
        ],
        out_specs=pl.BlockSpec((TM, OUT_PAD), _tile_map),
    )

    out_pad = pl.pallas_call(
        _generator_kernel,
        out_shape=jax.ShapeDtypeStruct((B_pad, OUT_PAD), jnp.float32),
        grid_spec=grid_spec,
        compiler_params=pltpu.CompilerParams(
            dimension_semantics=("parallel",),
            vmem_limit_bytes=16 << 20),
    )(keep, x_pad, xo_pad, *prepared_params)

    out = out_pad[:B, :IN_DIM]

    if out.shape[0] != batch_size:
        raise ValueError("batch size does not match")
    # TODO(synk): the ValueError raise itself must stay host-side (needs a
    # device->host sync); the NaN reduction is fused into the kernel above.
    if check_nan and bool(jnp.any(out_pad[:B, IN_DIM] > 0.5)):
        raise ValueError("NaN detected in input data")
    return out


def init_params(key):
    """Init mimicking PyTorch Linear default (U[-1/sqrt(fan_in), +])."""
    def linear(key, fan_in, fan_out):
        kw, kb = jax.random.split(key)
        bound = 1.0 / jnp.sqrt(fan_in)
        # stored as (in_features, out_features): already transposed for x @ W
        w = jax.random.uniform(kw, (fan_in, fan_out), jnp.float32, -bound, bound)
        b = jax.random.uniform(kb, (1, fan_out), jnp.float32, -bound, bound)
        return w, b

    k1, k2, k3, k4 = jax.random.split(key, 4)
    w1, b1 = linear(k1, N_H4, N_H3)     # 1024 -> 512
    w2, b2 = linear(k2, N_H3, N_H2)     # 512  -> 256
    w3, b3 = linear(k3, N_H2, N_H1)     # 256  -> 128
    w4, b4 = linear(k4, N_H1, IN_DIM)   # 128  -> 7
    return (w1, b1, w2, b2, w3, b3, w4, b4)


def _reference_forward(params, x, x_the_other, Missing_item):
    """Pure-JAX reference emulating the kernel's dtype flow (bf16 matmul inputs,
    f32 accumulate / elementwise)."""
    w1, b1, w2, b2, w3, b3, w4, b4 = params

    def layer(h, w, b):
        return jnp.dot(h.astype(jnp.bfloat16), w.astype(jnp.bfloat16),
                       preferred_element_type=jnp.float32) + b

    h = _leaky_relu(layer(x, w1, b1))
    h = _leaky_relu(layer(h, w2, b2))
    h = _leaky_relu(layer(h, w3, b3))
    y = layer(h, w4, b4)
    if Missing_item != IN_DIM:
        keep = IN_DIM - Missing_item
        y = y.at[:, :keep].set(x_the_other[:, :keep])
    return y


if __name__ == "__main__":
    key = jax.random.PRNGKey(0)
    kp, kx, ko = jax.random.split(key, 3)

    batch = 8
    Missing_item = 3

    params = init_params(kp)
    prepared = prepare_params(params)                                # bf16 once
    x = jax.random.normal(kx, (batch, N_H4), jnp.float32)            # (8, 1024)
    x_the_other = jax.random.normal(ko, (batch, IN_DIM), jnp.float32)  # (8, 7)

    out = generator_tabular_3_forward(prepared, x, x_the_other, Missing_item, batch)
    out = jax.block_until_ready(out)

    ref = _reference_forward(params, x, x_the_other, Missing_item)
    assert out.shape == (batch, IN_DIM)
    assert jnp.allclose(out, ref, atol=2e-3, rtol=2e-3), "mismatch vs reference"

    # A different Missing_item only changes the prefetched SMEM scalar.
    out2 = jax.block_until_ready(
        generator_tabular_3_forward(prepared, x, x_the_other, IN_DIM, batch))
    ref2 = _reference_forward(params, x, x_the_other, IN_DIM)
    assert jnp.allclose(out2, ref2, atol=2e-3, rtol=2e-3), "mismatch vs reference (no-overwrite branch)"

    print("KERNEL_OK")
</pallas_src>

<mosaic_0001>
module attributes {stable_mosaic.version = 11 : i64} {
  func.func @_generator_kernel(%arg0: i32, %arg1: memref<1xi32, #tpu.memory_space<smem>>, %arg2: memref<8x1024xf32, #tpu.memory_space<vmem>>, %arg3: memref<8x128xf32, #tpu.memory_space<vmem>>, %arg4: memref<1024x512xbf16, #tpu.memory_space<vmem>>, %arg5: memref<1x512xf32, #tpu.memory_space<vmem>>, %arg6: memref<512x256xbf16, #tpu.memory_space<vmem>>, %arg7: memref<1x256xf32, #tpu.memory_space<vmem>>, %arg8: memref<256x128xbf16, #tpu.memory_space<vmem>>, %arg9: memref<1x128xf32, #tpu.memory_space<vmem>>, %arg10: memref<128x128xbf16, #tpu.memory_space<vmem>>, %arg11: memref<1x128xf32, #tpu.memory_space<vmem>>, %arg12: memref<8x128xf32, #tpu.memory_space<vmem>>) attributes {dimension_semantics = [#tpu.dimension_semantics<parallel>], iteration_bounds = array<i64: 1>, scalar_prefetch = 1 : i64, scratch_operands = 0 : i64, tpu.core_type = #tpu.core_type<tc>, window_params = [{transform_indices = @transform_0, window_bounds = array<i64: 8, 1024>}, {transform_indices = @transform_1, window_bounds = array<i64: 8, 128>}, {pipeline_mode = #tpu.pipeline_mode<synchronous>, transform_indices = @transform_2, window_bounds = array<i64: 1024, 512>}, {pipeline_mode = #tpu.pipeline_mode<synchronous>, transform_indices = @transform_3, window_bounds = array<i64: 1, 512>}, {pipeline_mode = #tpu.pipeline_mode<synchronous>, transform_indices = @transform_4, window_bounds = array<i64: 512, 256>}, {pipeline_mode = #tpu.pipeline_mode<synchronous>, transform_indices = @transform_5, window_bounds = array<i64: 1, 256>}, {pipeline_mode = #tpu.pipeline_mode<synchronous>, transform_indices = @transform_6, window_bounds = array<i64: 256, 128>}, {pipeline_mode = #tpu.pipeline_mode<synchronous>, transform_indices = @transform_7, window_bounds = array<i64: 1, 128>}, {pipeline_mode = #tpu.pipeline_mode<synchronous>, transform_indices = @transform_8, window_bounds = array<i64: 128, 128>}, {pipeline_mode = #tpu.pipeline_mode<synchronous>, transform_indices = @transform_9, window_bounds = array<i64: 1, 128>}, {transform_indices = @transform_10, window_bounds = array<i64: 8, 128>}]} {
    %c0 = arith.constant 0 : index
    %c0_0 = arith.constant 0 : index
    %0 = vector.load %arg2[%c0, %c0_0] : memref<8x1024xf32, #tpu.memory_space<vmem>>, vector<8x1024xf32>
    %1 = arith.cmpf one, %0, %0 : vector<8x1024xf32>
    %cst = arith.constant 1.000000e+00 : f32
    %cst_1 = arith.constant 0.000000e+00 : f32
    %2 = vector.broadcast %cst : f32 to vector<8x1024xf32>
    %3 = vector.broadcast %cst_1 : f32 to vector<8x1024xf32>
    %4 = arith.select %1, %2, %3 : vector<8x1024xi1>, vector<8x1024xf32>
    %cst_2 = arith.constant dense<0xFF800000> : vector<8xf32>
    %5 = vector.multi_reduction <maximumf>, %4, %cst_2 [1] : vector<8x1024xf32> to vector<8xf32>
    %6 = vector.shape_cast %5 : vector<8xf32> to vector<8x1xf32>
    %7 = arith.truncf %0 : vector<8x1024xf32> to vector<8x1024xbf16>
    %c0_3 = arith.constant 0 : index
    %c0_4 = arith.constant 0 : index
    %8 = vector.load %arg4[%c0_3, %c0_4] : memref<1024x512xbf16, #tpu.memory_space<vmem>>, vector<1024x512xbf16>
    %cst_5 = arith.constant dense<0.000000e+00> : vector<8x512xf32>
    %9 = tpu.matmul %7, %8, %cst_5 {dimension_numbers = #tpu.dot_dimension_numbers<[1], [0], [0], [1], [0, 0, 1, 1], [], []>} : vector<8x1024xbf16>, vector<1024x512xbf16>, vector<8x512xf32> -> vector<8x512xf32>
    %c0_6 = arith.constant 0 : index
    %c0_7 = arith.constant 0 : index
    %10 = vector.load %arg5[%c0_6, %c0_7] : memref<1x512xf32, #tpu.memory_space<vmem>>, vector<1x512xf32>
    %11 = vector.broadcast %10 : vector<1x512xf32> to vector<8x512xf32>
    %12 = arith.addf %9, %11 : vector<8x512xf32>
    %cst_8 = arith.constant 0.000000e+00 : f32
    %13 = vector.broadcast %cst_8 : f32 to vector<8x512xf32>
    %14 = arith.cmpf ogt, %12, %13 : vector<8x512xf32>
    %cst_9 = arith.constant 0.00999999977 : f32
    %15 = vector.broadcast %cst_9 : f32 to vector<8x512xf32>
    %16 = arith.mulf %15, %12 : vector<8x512xf32>
    %17 = arith.select %14, %12, %16 : vector<8x512xi1>, vector<8x512xf32>
    %18 = arith.truncf %17 : vector<8x512xf32> to vector<8x512xbf16>
    %c0_10 = arith.constant 0 : index
    %c0_11 = arith.constant 0 : index
    %19 = vector.load %arg6[%c0_10, %c0_11] : memref<512x256xbf16, #tpu.memory_space<vmem>>, vector<512x256xbf16>
    %cst_12 = arith.constant dense<0.000000e+00> : vector<8x256xf32>
    %20 = tpu.matmul %18, %19, %cst_12 {dimension_numbers = #tpu.dot_dimension_numbers<[1], [0], [0], [1], [0, 0, 1, 1], [], []>} : vector<8x512xbf16>, vector<512x256xbf16>, vector<8x256xf32> -> vector<8x256xf32>
    %c0_13 = arith.constant 0 : index
    %c0_14 = arith.constant 0 : index
    %21 = vector.load %arg7[%c0_13, %c0_14] : memref<1x256xf32, #tpu.memory_space<vmem>>, vector<1x256xf32>
    %22 = vector.broadcast %21 : vector<1x256xf32> to vector<8x256xf32>
    %23 = arith.addf %20, %22 : vector<8x256xf32>
    %cst_15 = arith.constant 0.000000e+00 : f32
    %24 = vector.broadcast %cst_15 : f32 to vector<8x256xf32>
    %25 = arith.cmpf ogt, %23, %24 : vector<8x256xf32>
    %cst_16 = arith.constant 0.00999999977 : f32
    %26 = vector.broadcast %cst_16 : f32 to vector<8x256xf32>
    %27 = arith.mulf %26, %23 : vector<8x256xf32>
    %28 = arith.select %25, %23, %27 : vector<8x256xi1>, vector<8x256xf32>
    %29 = arith.truncf %28 : vector<8x256xf32> to vector<8x256xbf16>
    %c0_17 = arith.constant 0 : index
    %c0_18 = arith.constant 0 : index
    %30 = vector.load %arg8[%c0_17, %c0_18] : memref<256x128xbf16, #tpu.memory_space<vmem>>, vector<256x128xbf16>
    %cst_19 = arith.constant dense<0.000000e+00> : vector<8x128xf32>
    %31 = tpu.matmul %29, %30, %cst_19 {dimension_numbers = #tpu.dot_dimension_numbers<[1], [0], [0], [1], [0, 0, 1, 1], [], []>} : vector<8x256xbf16>, vector<256x128xbf16>, vector<8x128xf32> -> vector<8x128xf32>
    %c0_20 = arith.constant 0 : index
    %c0_21 = arith.constant 0 : index
    %32 = vector.load %arg9[%c0_20, %c0_21] : memref<1x128xf32, #tpu.memory_space<vmem>>, vector<1x128xf32>
    %33 = vector.broadcast %32 : vector<1x128xf32> to vector<8x128xf32>
    %34 = arith.addf %31, %33 : vector<8x128xf32>
    %cst_22 = arith.constant 0.000000e+00 : f32
    %35 = vector.broadcast %cst_22 : f32 to vector<8x128xf32>
    %36 = arith.cmpf ogt, %34, %35 : vector<8x128xf32>
    %cst_23 = arith.constant 0.00999999977 : f32
    %37 = vector.broadcast %cst_23 : f32 to vector<8x128xf32>
    %38 = arith.mulf %37, %34 : vector<8x128xf32>
    %39 = arith.select %36, %34, %38 : vector<8x128xi1>, vector<8x128xf32>
    %40 = arith.truncf %39 : vector<8x128xf32> to vector<8x128xbf16>
    %c0_24 = arith.constant 0 : index
    %c0_25 = arith.constant 0 : index
    %41 = vector.load %arg10[%c0_24, %c0_25] : memref<128x128xbf16, #tpu.memory_space<vmem>>, vector<128x128xbf16>
    %cst_26 = arith.constant dense<0.000000e+00> : vector<8x128xf32>
    %42 = tpu.matmul %40, %41, %cst_26 {dimension_numbers = #tpu.dot_dimension_numbers<[1], [0], [0], [1], [0, 0, 1, 1], [], []>} : vector<8x128xbf16>, vector<128x128xbf16>, vector<8x128xf32> -> vector<8x128xf32>
    %c0_27 = arith.constant 0 : index
    %c0_28 = arith.constant 0 : index
    %43 = vector.load %arg11[%c0_27, %c0_28] : memref<1x128xf32, #tpu.memory_space<vmem>>, vector<1x128xf32>
    %44 = vector.broadcast %43 : vector<1x128xf32> to vector<8x128xf32>
    %45 = arith.addf %42, %44 : vector<8x128xf32>
    %c0_29 = arith.constant 0 : index
    %46 = memref.load %arg1[%c0_29] : memref<1xi32, #tpu.memory_space<smem>>
    %47 = tpu.iota {dimensions = array<i32: 1>} : vector<8x128xi32>
    %48 = vector.broadcast %46 : i32 to vector<8x128xi32>
    %49 = arith.cmpi slt, %47, %48 : vector<8x128xi32>
    %c0_30 = arith.constant 0 : index
    %c0_31 = arith.constant 0 : index
    %50 = vector.load %arg3[%c0_30, %c0_31] : memref<8x128xf32, #tpu.memory_space<vmem>>, vector<8x128xf32>
    %51 = arith.select %49, %50, %45 : vector<8x128xi1>, vector<8x128xf32>
    %c7_i32 = arith.constant 7 : i32
    %52 = vector.broadcast %c7_i32 : i32 to vector<8x128xi32>
    %53 = arith.cmpi eq, %47, %52 : vector<8x128xi32>
    %54 = vector.shape_cast %6 : vector<8x1xf32> to vector<8x1xf32>
    %55 = vector.broadcast %54 : vector<8x1xf32> to vector<8x128xf32>
    %56 = arith.select %53, %55, %51 : vector<8x128xi1>, vector<8x128xf32>
    %c0_32 = arith.constant 0 : index
    %c0_33 = arith.constant 0 : index
    %57 = vector.load %arg12[%c0_32, %c0_33] : memref<8x128xf32, #tpu.memory_space<vmem>>, vector<8x128xf32>
    tpu.vector_store %arg12[%c0_32, %c0_33], %56 {strides = array<i32>} : memref<8x128xf32, #tpu.memory_space<vmem>>, vector<8x128xf32>,
    return
  }
  func.func @transform_0(%arg0: i32, %arg1: memref<1xi32, #tpu.memory_space<smem>>) -> (i32, i32) {
    %c0_i32 = arith.constant 0 : i32
    %c0_i32_0 = arith.constant 0 : i32
    return %arg0, %c0_i32 : i32, i32
  }
  func.func @transform_1(%arg0: i32, %arg1: memref<1xi32, #tpu.memory_space<smem>>) -> (i32, i32) {
    %c0_i32 = arith.constant 0 : i32
    %c0_i32_0 = arith.constant 0 : i32
    return %arg0, %c0_i32 : i32, i32
  }
  func.func @transform_2(%arg0: i32, %arg1: memref<1xi32, #tpu.memory_space<smem>>) -> (i32, i32) {
    %c0_i32 = arith.constant 0 : i32
    %c0_i32_0 = arith.constant 0 : i32
    %c0_i32_1 = arith.constant 0 : i32
    return %c0_i32, %c0_i32_0 : i32, i32
  }
  func.func @transform_3(%arg0: i32, %arg1: memref<1xi32, #tpu.memory_space<smem>>) -> (i32, i32) {
    %c0_i32 = arith.constant 0 : i32
    %c0_i32_0 = arith.constant 0 : i32
    %c0_i32_1 = arith.constant 0 : i32
    return %c0_i32, %c0_i32_0 : i32, i32
  }
  func.func @transform_4(%arg0: i32, %arg1: memref<1xi32, #tpu.memory_space<smem>>) -> (i32, i32) {
    %c0_i32 = arith.constant 0 : i32
    %c0_i32_0 = arith.constant 0 : i32
    %c0_i32_1 = arith.constant 0 : i32
    return %c0_i32, %c0_i32_0 : i32, i32
  }
  func.func @transform_5(%arg0: i32, %arg1: memref<1xi32, #tpu.memory_space<smem>>) -> (i32, i32) {
    %c0_i32 = arith.constant 0 : i32
    %c0_i32_0 = arith.constant 0 : i32
    %c0_i32_1 = arith.constant 0 : i32
    return %c0_i32, %c0_i32_0 : i32, i32
  }
  func.func @transform_6(%arg0: i32, %arg1: memref<1xi32, #tpu.memory_space<smem>>) -> (i32, i32) {
    %c0_i32 = arith.constant 0 : i32
    %c0_i32_0 = arith.constant 0 : i32
    %c0_i32_1 = arith.constant 0 : i32
    return %c0_i32, %c0_i32_0 : i32, i32
  }
  func.func @transform_7(%arg0: i32, %arg1: memref<1xi32, #tpu.memory_space<smem>>) -> (i32, i32) {
    %c0_i32 = arith.constant 0 : i32
    %c0_i32_0 = arith.constant 0 : i32
    %c0_i32_1 = arith.constant 0 : i32
    return %c0_i32, %c0_i32_0 : i32, i32
  }
  func.func @transform_8(%arg0: i32, %arg1: memref<1xi32, #tpu.memory_space<smem>>) -> (i32, i32) {
    %c0_i32 = arith.constant 0 : i32
    %c0_i32_0 = arith.constant 0 : i32
    %c0_i32_1 = arith.constant 0 : i32
    return %c0_i32, %c0_i32_0 : i32, i32
  }
  func.func @transform_9(%arg0: i32, %arg1: memref<1xi32, #tpu.memory_space<smem>>) -> (i32, i32) {
    %c0_i32 = arith.constant 0 : i32
    %c0_i32_0 = arith.constant 0 : i32
    %c0_i32_1 = arith.constant 0 : i32
    return %c0_i32, %c0_i32_0 : i32, i32
  }
  func.func @transform_10(%arg0: i32, %arg1: memref<1xi32, #tpu.memory_space<smem>>) -> (i32, i32) {
    %c0_i32 = arith.constant 0 : i32
    %c0_i32_0 = arith.constant 0 : i32
    return %arg0, %c0_i32 : i32, i32
  }
}

</mosaic_0001>

<bundles_post_ra>
// kernel: tpu_custom_call.1
= control target key start
LH: loop header
LB: loop body
LE: loop exit
PB: predicated region body
PF: predicated region fallthrough
CT: control target
= control target key end

     0   :  { %17 = vsyncpa [#allocation5], 0  ;;  %s5046_s0 = inlined_call_operand.<no memory space> [shape: s32[1], index: 0, kind: input, shape index: {}]   ;;  %s5047_s1 = inlined_call_operand.hbm [shape: f32[8,1024], index: 1, kind: input, shape index: {}]   ;;  %s5048_s2 = inlined_call_operand.hbm [shape: f32[8,128], index: 2, kind: input, shape index: {}]   ;;  %s5049_s3 = inlined_call_operand.hbm [shape: bf16[1024,512], index: 3, kind: input, shape index: {}]   ;;  %s5050_s4 = inlined_call_operand.vmem [shape: f32[1,512], index: 4, kind: input, shape index: {}]   ;;  %s5051_s5 = inlined_call_operand.hbm [shape: bf16[512,256], index: 5, kind: input, shape index: {}]   ;;  %s5052_s6 = inlined_call_operand.vmem [shape: f32[1,256], index: 6, kind: input, shape index: {}]   ;;  %s5053_s7 = inlined_call_operand.hbm [shape: bf16[256,128], index: 7, kind: input, shape index: {}]   ;;  %s5054_s8 = inlined_call_operand.vmem [shape: f32[1,128], index: 8, kind: input, shape index: {}]   ;;  %s5055_s9 = inlined_call_operand.hbm [shape: bf16[128,128], index: 9, kind: input, shape index: {}]   ;;  %s5056_s10 = inlined_call_operand.vmem [shape: f32[1,128], index: 10, kind: input, shape index: {}]   ;;  %s5057_s11 = inlined_call_operand.hbm [shape: f32[8,128], index: 11, kind: output, shape index: {}]  }
   0x1   :  { %18 = vsyncpa [#allocation8], 0 }
   0x2   :  { %19 = vsyncpa [#allocation11], 0 }
   0x3   :  { %20 = vsyncpa [#allocation14], 0  ;;  %s38_s19 = sshll.u32 %s5048_s2, 4  ;;  %s39_s19 = int_to_ptr.hbm [resolvable:$true] %s38_s19 }
   0x4   :  { %21 = vsyncpa [#allocation6], 0  ;;  %s4845_s20 = smov [#allocation7]   ;;  %s63_s24 = sshll.u32 %s5051_s5, 4  ;;  %s64_s24 = int_to_ptr.hbm [resolvable:$true] %s63_s24 }
   0x5   :  { %s40_s21 = sshll.u32 %s4845_s20, 4  ;;  %s4846_s25 = smov [#allocation10]   ;;  %s41_s21 = int_to_ptr.vmem [resolvable:$true] %s40_s21 }
   0x6   :  { %43 = dma.hbm_to_vmem [thread:$0]  %s39_s19, 128, %s41_s21, [#allocation8]  }
   0x7   :  { %s65_s26 = sshll.u32 %s4846_s25, 4  ;;  %s4847_s27 = smov 128   ;;  %s66_s26 = int_to_ptr.vmem [resolvable:$true] %s65_s26 }
   0x8   :  { %s4848_s28 = smov 8   ;;  %s27_s2 = sshll.u32 %s5047_s1, 4  ;;  %s28_s2 = int_to_ptr.hbm [resolvable:$true] %s27_s2 }
   0x9   :  { %71 = dma.hbm_to_vmem [thread:$0]  %s64_s24, 8192, %s66_s26, [#allocation11], %s4847_s27, %s4847_s27, %s4848_s28  }
   0xa   :  { %s4849_s12 = smov [#allocation4]   ;;  %s48_s5 = sshll.u32 %s5049_s3, 4  ;;  %s49_s5 = int_to_ptr.hbm [resolvable:$true] %s48_s5 }
   0xb   :  { %s29_s13 = sshll.u32 %s4849_s12, 4  ;;  %s4850_s16 = smov [#allocation9]   ;;  %s30_s13 = int_to_ptr.vmem [resolvable:$true] %s29_s13 }
   0xc   :  { %32 = dma.hbm_to_vmem [thread:$0]  %s28_s2, 1024, %s30_s13, [#allocation5]  }
   0xd   :  { %s50_s17 = sshll.u32 %s4850_s16, 4  ;;  %s4851_s18 = smov 256   ;;  %s51_s17 = int_to_ptr.vmem [resolvable:$true] %s50_s17 }
   0xe   :  { %s4852_s19 = smov 16   ;;  %s78_s1 = sshll.u32 %s5053_s7, 4  ;;  %s79_s1 = int_to_ptr.hbm [resolvable:$true] %s78_s1 }
   0xf   :  { %56 = dma.hbm_to_vmem [thread:$0]  %s49_s5, 32768, %s51_s17, [#allocation8], %s4851_s18, %s4851_s18, %s4852_s19  }
  0x10   :  { %s4853_s22 = smov [#allocation12]   ;;  %s93_s3 = sshll.u32 %s5055_s9, 4  ;;  %s94_s3 = int_to_ptr.hbm [resolvable:$true] %s93_s3 }
  0x11   :  { %s80_s23 = sshll.u32 %s4853_s22, 4  ;;  %s4854_s26 = smov 64   ;;  %s81_s23 = int_to_ptr.vmem [resolvable:$true] %s80_s23 }
  0x12   :  { %s4855_s27 = smov 4   ;;  %s4856_s28 = smov [#allocation13]  }
  0x13   :  { %86 = dma.hbm_to_vmem [thread:$0]  %s79_s1, 2048, %s81_s23, [#allocation11], %s4854_s26, %s4854_s26, %s4855_s27  }
  0x14   :  { %s95_s29 = sshll.u32 %s4856_s28, 4  ;;  %s96_s29 = int_to_ptr.vmem [resolvable:$true] %s95_s29 }
  0x15   :  { %101 = dma.hbm_to_vmem [thread:$0]  %s94_s3, 1024, %s96_s29, [#allocation14], %s4854_s26, %s4854_s26, %s4855_s27  }
  0x16   :  { %4835 = dma.done.wait [#allocation5], 1024  }
  0x17   :  { %4836 = vsyncadd [#allocation5], 4294966272 }
  0x18   :  { %4837 = dma.done.wait [#allocation8], 32896  }
  0x19   :  { %4838 = vsyncadd [#allocation8], 4294934400 }
  0x1a   :  { %4839 = dma.done.wait [#allocation11], 10240  }
  0x1b   :  { %4840 = vsyncadd [#allocation11], 4294957056 }
  0x1c   :  { %4841 = dma.done.wait [#allocation14], 1024  }
  0x1d   :  { %4842 = vsyncadd [#allocation14], 4294966272  ;;  %v3036_v0 = vld [vmem:[#allocation9 + $0xe0] sm:$0xf]  ;;  %v4328_v1 = vld [vmem:[#allocation9 + $0xec] sm:$0xf0] }
  0x1e   :  { %v3164_v2 = vld [vmem:[#allocation9 + $0x1e0] sm:$0xf]  ;;  %v3037_v3 = vor.u32 %v4328_v1, %v3036_v0  ;;  %v4360_v4 = vld [vmem:[#allocation9 + $0x1ec] sm:$0xf0]  ;;  %s2909_s20 = sshll.u32 %s5057_s11, 4  ;;  %s2910_s20 = int_to_ptr.hbm [resolvable:$true] %s2909_s20 }
  0x1f   :  { %v3292_v5 = vld [vmem:[#allocation9 + $0x2e0] sm:$0xf]  ;;  %v4392_v6 = vld [vmem:[#allocation9 + $0x2ec] sm:$0xf0]  ;;  %v3165_v7 = vor.u32 %v4360_v4, %v3164_v2 }
  0x20   :  { %v3293_v8 = vor.u32 %v4392_v6, %v3292_v5  ;;  %v3420_v9 = vld [vmem:[#allocation9 + $0x3e0] sm:$0xf]  ;;  %v4424_v10 = vld [vmem:[#allocation9 + $0x3ec] sm:$0xf0]  ;;  %1715 = vmatpush.bf16.msra.mxu0 %v3037_v3 }
  0x21   :  { %v3020_v11 = vld [vmem:[#allocation9 + $0xc0] sm:$0xf]  ;;  %v3421_v12 = vor.u32 %v4424_v10, %v3420_v9  ;;  %v4324_v13 = vld [vmem:[#allocation9 + $0xcc] sm:$0xf0]  ;;  %1728 = vmatpush.bf16.msra.mxu1 %v3165_v7 }
  0x22   :  { %v3148_v14 = vld [vmem:[#allocation9 + $0x1c0] sm:$0xf]  ;;  %v4356_v15 = vld [vmem:[#allocation9 + $0x1cc] sm:$0xf0]  ;;  %1741 = vmatpush.bf16.msra.mxu2 %v3293_v8  ;;  %v3021_v16 = vor.u32 %v4324_v13, %v3020_v11 }
  0x23   :  { %v3149_v17 = vor.u32 %v4356_v15, %v3148_v14  ;;  %v3276_v18 = vld [vmem:[#allocation9 + $0x2c0] sm:$0xf]  ;;  %v4388_v19 = vld [vmem:[#allocation9 + $0x2cc] sm:$0xf0]  ;;  %1754 = vmatpush.bf16.msra.mxu3 %v3421_v12 }
  0x24   :  { %v3404_v20 = vld [vmem:[#allocation9 + $0x3c0] sm:$0xf]  ;;  %v3277_v21 = vor.u32 %v4388_v19, %v3276_v18  ;;  %v4420_v22 = vld [vmem:[#allocation9 + $0x3cc] sm:$0xf0]  ;;  %1716 = vmatpush.bf16.msra.mxu0 %v3021_v16 }
  0x25   :  { %v3004_v23 = vld [vmem:[#allocation9 + $0xa0] sm:$0xf]  ;;  %v4320_v24 = vld [vmem:[#allocation9 + $0xac] sm:$0xf0]  ;;  %v3405_v25 = vor.u32 %v4420_v22, %v3404_v20  ;;  %1729 = vmatpush.bf16.msra.mxu1 %v3149_v17 }
  0x26   :  { %v3132_v26 = vld [vmem:[#allocation9 + $0x1a0] sm:$0xf]  ;;  %v4352_v27 = vld [vmem:[#allocation9 + $0x1ac] sm:$0xf0]  ;;  %v3005_v29 = vor.u32 %v4320_v24, %v3004_v23  ;;  %1742 = vmatpush.bf16.msra.mxu2 %v3277_v21 }
  0x27   :  { %v3260_v28 = vld [vmem:[#allocation9 + $0x2a0] sm:$0xf]  ;;  %v4384_v30 = vld [vmem:[#allocation9 + $0x2ac] sm:$0xf0]  ;;  %v3133_v33 = vor.u32 %v4352_v27, %v3132_v26  ;;  %1755 = vmatpush.bf16.msra.mxu3 %v3405_v25 }
  0x28   :  { %v3388_v31 = vld [vmem:[#allocation9 + $0x3a0] sm:$0xf]  ;;  %v4416_v32 = vld [vmem:[#allocation9 + $0x3ac] sm:$0xf0]  ;;  %v3261_v34 = vor.u32 %v4384_v30, %v3260_v28  ;;  %1717 = vmatpush.bf16.msra.mxu0 %v3005_v29 }
  0x29   :  { %v2988_v35 = vld [vmem:[#allocation9 + $0x80] sm:$0xf]  ;;  %v4316_v36 = vld [vmem:[#allocation9 + $0x8c] sm:$0xf0]  ;;  %v3389_v38 = vor.u32 %v4416_v32, %v3388_v31  ;;  %1730 = vmatpush.bf16.msra.mxu1 %v3133_v33 }
  0x2a   :  { %v3116_v37 = vld [vmem:[#allocation9 + $0x180] sm:$0xf]  ;;  %v4348_v39 = vld [vmem:[#allocation9 + $0x18c] sm:$0xf0]  ;;  %v2989_v44 = vor.u32 %v4316_v36, %v2988_v35  ;;  %1743 = vmatpush.bf16.msra.mxu2 %v3261_v34 }
  0x2b   :  { %v3244_v40 = vld [vmem:[#allocation9 + $0x280] sm:$0xf]  ;;  %v4380_v41 = vld [vmem:[#allocation9 + $0x28c] sm:$0xf0]  ;;  %v3117_v45 = vor.u32 %v4348_v39, %v3116_v37  ;;  %1756 = vmatpush.bf16.msra.mxu3 %v3389_v38 }
  0x2c   :  { %v3372_v42 = vld [vmem:[#allocation9 + $0x380] sm:$0xf]  ;;  %v4412_v43 = vld [vmem:[#allocation9 + $0x38c] sm:$0xf0]  ;;  %v3245_v46 = vor.u32 %v4380_v41, %v3244_v40  ;;  %1718 = vmatpush.bf16.msra.mxu0 %v2989_v44 }
  0x2d   :  { %v2972_v47 = vld [vmem:[#allocation9 + $0x60] sm:$0xf]  ;;  %v4312_v48 = vld [vmem:[#allocation9 + $0x6c] sm:$0xf0]  ;;  %v3373_v50 = vor.u32 %v4412_v43, %v3372_v42  ;;  %1731 = vmatpush.bf16.msra.mxu1 %v3117_v45 }
  0x2e   :  { %v3100_v49 = vld [vmem:[#allocation9 + $0x160] sm:$0xf]  ;;  %v4344_v51 = vld [vmem:[#allocation9 + $0x16c] sm:$0xf0]  ;;  %v2973_v56 = vor.u32 %v4312_v48, %v2972_v47  ;;  %1744 = vmatpush.bf16.msra.mxu2 %v3245_v46 }
  0x2f   :  { %v3228_v52 = vld [vmem:[#allocation9 + $0x260] sm:$0xf]  ;;  %v4376_v53 = vld [vmem:[#allocation9 + $0x26c] sm:$0xf0]  ;;  %v3101_v57 = vor.u32 %v4344_v51, %v3100_v49  ;;  %1757 = vmatpush.bf16.msra.mxu3 %v3373_v50 }
  0x30   :  { %v3356_v54 = vld [vmem:[#allocation9 + $0x360] sm:$0xf]  ;;  %v4408_v55 = vld [vmem:[#allocation9 + $0x36c] sm:$0xf0]  ;;  %v3229_v58 = vor.u32 %v4376_v53, %v3228_v52  ;;  %1719 = vmatpush.bf16.msra.mxu0 %v2973_v56 }
  0x31   :  { %v2956_v59 = vld [vmem:[#allocation9 + $0x40] sm:$0xf]  ;;  %v4308_v60 = vld [vmem:[#allocation9 + $0x4c] sm:$0xf0]  ;;  %v3357_v62 = vor.u32 %v4408_v55, %v3356_v54  ;;  %1732 = vmatpush.bf16.msra.mxu1 %v3101_v57 }
  0x32   :  { %v3084_v61 = vld [vmem:[#allocation9 + $0x140] sm:$0xf]  ;;  %v4340_v63 = vld [vmem:[#allocation9 + $0x14c] sm:$0xf0]  ;;  %v2957_v4 = vor.u32 %v4308_v60, %v2956_v59  ;;  %1745 = vmatpush.bf16.msra.mxu2 %v3229_v58  ;;  %v130_v58 = vld [vmem:[#allocation4 + $0x10] sm:$0xff] }
  0x33   :  { %v3212_v0 = vld [vmem:[#allocation9 + $0x240] sm:$0xf]  ;;  %v4372_v1 = vld [vmem:[#allocation9 + $0x24c] sm:$0xf0]  ;;  %v3085_v5 = vor.u32 %v4340_v63, %v3084_v61  ;;  %1758 = vmatpush.bf16.msra.mxu3 %v3357_v62  ;;  %v4937_v63 = vpack.c.bf16 %v130_v58, %v130_v58 }
  0x34   :  { %v3340_v2 = vld [vmem:[#allocation9 + $0x340] sm:$0xf]  ;;  %v4404_v3 = vld [vmem:[#allocation9 + $0x34c] sm:$0xf0]  ;;  %v3213_v6 = vor.u32 %v4372_v1, %v3212_v0  ;;  %1720 = vmatpush.bf16.msra.mxu0 %v2957_v4 }
  0x35   :  { %v2940_v7 = vld [vmem:[#allocation9 + $0x20] sm:$0xf]  ;;  %v4304_v8 = vld [vmem:[#allocation9 + $0x2c] sm:$0xf0]  ;;  %v3341_v10 = vor.u32 %v4404_v3, %v3340_v2  ;;  %1733 = vmatpush.bf16.msra.mxu1 %v3085_v5  ;;  %v128_v5 = vld [vmem:[#allocation4] sm:$0xff] }
  0x36   :  { %v3068_v9 = vld [vmem:[#allocation9 + $0x120] sm:$0xf]  ;;  %v4336_v11 = vld [vmem:[#allocation9 + $0x12c] sm:$0xf0]  ;;  %v2941_v16 = vor.u32 %v4304_v8, %v2940_v7  ;;  %1746 = vmatpush.bf16.msra.mxu2 %v3213_v6 }
  0x37   :  { %v3196_v12 = vld [vmem:[#allocation9 + $0x220] sm:$0xf]  ;;  %v4368_v13 = vld [vmem:[#allocation9 + $0x22c] sm:$0xf0]  ;;  %v3069_v19 = vor.u32 %v4336_v11, %v3068_v9  ;;  %1759 = vmatpush.bf16.msra.mxu3 %v3341_v10  ;;  %v4940_v9 = vpack.c.bf16 %v128_v5, %v128_v5  ;;  %v4326_v5 = vld [vmem:[#allocation9 + $0xe4] sm:$0xf] }
  0x38   :  { %v3324_v14 = vld [vmem:[#allocation9 + $0x320] sm:$0xf]  ;;  %v4400_v15 = vld [vmem:[#allocation9 + $0x32c] sm:$0xf0]  ;;  %v3197_v20 = vor.u32 %v4368_v13, %v3196_v12  ;;  %1721 = vmatpush.bf16.msra.mxu0 %v2941_v16 }
  0x39   :  { %v2924_v17 = vld [vmem:[#allocation9] sm:$0xf]  ;;  %v4300_v18 = vld [vmem:[#allocation9 + $0xc] sm:$0xf0]  ;;  %v3325_v24 = vor.u32 %v4400_v15, %v3324_v14  ;;  %1734 = vmatpush.bf16.msra.mxu1 %v3069_v19 }
  0x3a   :  { %v3052_v21 = vld [vmem:[#allocation9 + $0x100] sm:$0xf]  ;;  %v4332_v22 = vld [vmem:[#allocation9 + $0x10c] sm:$0xf0]  ;;  %v2925_v31 = vor.u32 %v4300_v18, %v2924_v17  ;;  %1747 = vmatpush.bf16.msra.mxu2 %v3197_v20 }
  0x3b   :  { %v3180_v23 = vld [vmem:[#allocation9 + $0x200] sm:$0xf]  ;;  %v4364_v25 = vld [vmem:[#allocation9 + $0x20c] sm:$0xf0]  ;;  %v3053_v35 = vor.u32 %v4332_v22, %v3052_v21  ;;  %1760 = vmatpush.bf16.msra.mxu3 %v3325_v24 }
  0x3c   :  { %v3308_v26 = vld [vmem:[#allocation9 + $0x300] sm:$0xf]  ;;  %v4396_v27 = vld [vmem:[#allocation9 + $0x30c] sm:$0xf0]  ;;  %v3181_v36 = vor.u32 %v4364_v25, %v3180_v23  ;;  %1722 = vmatpush.bf16.msra.mxu0 %v2925_v31 }
  0x3d   :  { %v3548_v28 = vld [vmem:[#allocation9 + $0x4e0] sm:$0xf]  ;;  %v4456_v29 = vld [vmem:[#allocation9 + $0x4ec] sm:$0xf0]  ;;  %v3309_v39 = vor.u32 %v4396_v27, %v3308_v26  ;;  %1735 = vmatpush.bf16.msra.mxu1 %v3053_v35 }
  0x3e   :  { %v3676_v30 = vld [vmem:[#allocation9 + $0x5e0] sm:$0xf]  ;;  %v4488_v32 = vld [vmem:[#allocation9 + $0x5ec] sm:$0xf0]  ;;  %v3549_v40 = vor.u32 %v4456_v29, %v3548_v28  ;;  %1748 = vmatpush.bf16.msra.mxu2 %v3181_v36 }
  0x3f   :  { %v3804_v33 = vld [vmem:[#allocation9 + $0x6e0] sm:$0xf]  ;;  %v4520_v34 = vld [vmem:[#allocation9 + $0x6ec] sm:$0xf0]  ;;  %v3677_v41 = vor.u32 %v4488_v32, %v3676_v30  ;;  %1761 = vmatpush.bf16.msra.mxu3 %v3309_v39  ;;  %1723 = vmatmul.bf16.vlgmr.msra.gmra.mxu0 %v4940_v9 }
  0x40   :  { %v3932_v37 = vld [vmem:[#allocation9 + $0x7e0] sm:$0xf]  ;;  %v4552_v38 = vld [vmem:[#allocation9 + $0x7ec] sm:$0xf0]  ;;  %v3805_v42 = vor.u32 %v4520_v34, %v3804_v33  ;;  %1767 = vmatpush.bf16.msrb.mxu0 %v3549_v40 }
  0x41   :  { %v3532_v43 = vld [vmem:[#allocation9 + $0x4c0] sm:$0xf]  ;;  %v4452_v44 = vld [vmem:[#allocation9 + $0x4cc] sm:$0xf0]  ;;  %v3933_v46 = vor.u32 %v4552_v38, %v3932_v37  ;;  %1780 = vmatpush.bf16.msrb.mxu1 %v3677_v41  ;;  %1749 = vmatmul.bf16.vlgmr.msra.gmra.mxu2 %v4937_v63 }
  0x42   :  { %v3660_v45 = vld [vmem:[#allocation9 + $0x5c0] sm:$0xf]  ;;  %v4484_v47 = vld [vmem:[#allocation9 + $0x5cc] sm:$0xf0]  ;;  %v3533_v52 = vor.u32 %v4452_v44, %v3532_v43  ;;  %1793 = vmatpush.bf16.msrb.mxu2 %v3805_v42 }
  0x43   :  { %v3788_v48 = vld [vmem:[#allocation9 + $0x6c0] sm:$0xf]  ;;  %v4516_v49 = vld [vmem:[#allocation9 + $0x6cc] sm:$0xf0]  ;;  %v3661_v54 = vor.u32 %v4484_v47, %v3660_v45  ;;  %1806 = vmatpush.bf16.msrb.mxu3 %v3933_v46 }
  0x44   :  { %v3916_v50 = vld [vmem:[#allocation9 + $0x7c0] sm:$0xf]  ;;  %v4548_v51 = vld [vmem:[#allocation9 + $0x7cc] sm:$0xf0]  ;;  %v3789_v55 = vor.u32 %v4516_v49, %v3788_v48  ;;  %1768 = vmatpush.bf16.msrb.mxu0 %v3533_v52 }
  0x45   :  { %v3516_v53 = vld [vmem:[#allocation9 + $0x4a0] sm:$0xf]  ;;  %v4448_v56 = vld [vmem:[#allocation9 + $0x4ac] sm:$0xf0]  ;;  %v3917_v59 = vor.u32 %v4548_v51, %v3916_v50  ;;  %1781 = vmatpush.bf16.msrb.mxu1 %v3661_v54 }
  0x46   :  { %v3644_v57 = vld [vmem:[#allocation9 + $0x5a0] sm:$0xf]  ;;  %v4480_v60 = vld [vmem:[#allocation9 + $0x5ac] sm:$0xf0]  ;;  %v3517_v2 = vor.u32 %v4448_v56, %v3516_v53  ;;  %1794 = vmatpush.bf16.msrb.mxu2 %v3789_v55 }
  0x47   :  { %v3772_v61 = vld [vmem:[#allocation9 + $0x6a0] sm:$0xf]  ;;  %v4512_v62 = vld [vmem:[#allocation9 + $0x6ac] sm:$0xf0]  ;;  %v3645_v6 = vor.u32 %v4480_v60, %v3644_v57  ;;  %1807 = vmatpush.bf16.msrb.mxu3 %v3917_v59 }
  0x48   :  { %v3900_v0 = vld [vmem:[#allocation9 + $0x7a0] sm:$0xf]  ;;  %v4544_v1 = vld [vmem:[#allocation9 + $0x7ac] sm:$0xf0]  ;;  %v3773_v7 = vor.u32 %v4512_v62, %v3772_v61  ;;  %1769 = vmatpush.bf16.msrb.mxu0 %v3517_v2 }
  0x49   :  { %v3500_v3 = vld [vmem:[#allocation9 + $0x480] sm:$0xf]  ;;  %v4444_v4 = vld [vmem:[#allocation9 + $0x48c] sm:$0xf0]  ;;  %v3901_v12 = vor.u32 %v4544_v1, %v3900_v0  ;;  %1782 = vmatpush.bf16.msrb.mxu1 %v3645_v6  ;;  %v3038_v6 = vld [vmem:[#allocation9 + $0xf0] sm:$0xf0] }
  0x4a   :  { %v3628_v8 = vld [vmem:[#allocation9 + $0x580] sm:$0xf]  ;;  %v131_v10 = vld [vmem:[#allocation4 + $0x18] sm:$0xff]  ;;  %v3501_v20 = vor.u32 %v4444_v4, %v3500_v3  ;;  %1795 = vmatpush.bf16.msrb.mxu2 %v3773_v7  ;;  %v4358_v7 = vld [vmem:[#allocation9 + $0x1e4] sm:$0xf] }
  0x4b   :  { %v129_v11 = vld [vmem:[#allocation4 + $0x8] sm:$0xff]  ;;  %v4476_v13 = vld [vmem:[#allocation9 + $0x58c] sm:$0xf0]  ;;  %v4942_v16 = vpack.c.bf16 %v131_v10, %v131_v10  ;;  %1808 = vmatpush.bf16.msrb.mxu3 %v3901_v12  ;;  %v3166_v10 = vld [vmem:[#allocation9 + $0x1f0] sm:$0xf0] }
  0x4c   :  { %v3756_v14 = vld [vmem:[#allocation9 + $0x680] sm:$0xf]  ;;  %v4508_v15 = vld [vmem:[#allocation9 + $0x68c] sm:$0xf0]  ;;  %v4944_v17 = vpack.c.bf16 %v129_v11, %v129_v11  ;;  %v3629_v21 = vor.u32 %v4476_v13, %v3628_v8  ;;  %1770 = vmatpush.bf16.msrb.mxu0 %v3501_v20  ;;  %v4390_v11 = vld [vmem:[#allocation9 + $0x2e4] sm:$0xf] }
  0x4d   :  { %v3884_v18 = vld [vmem:[#allocation9 + $0x780] sm:$0xf]  ;;  %v4540_v19 = vld [vmem:[#allocation9 + $0x78c] sm:$0xf0]  ;;  %1762 = vmatmul.bf16.vlgmr.msra.gmra.mxu3 %v4942_v16  ;;  %v3757_v22 = vor.u32 %v4508_v15, %v3756_v14  ;;  %v3294_v12 = vld [vmem:[#allocation9 + $0x2f0] sm:$0xf0] }
  0x4e   :  { %v3484_v23 = vld [vmem:[#allocation9 + $0x460] sm:$0xf]  ;;  %v4440_v24 = vld [vmem:[#allocation9 + $0x46c] sm:$0xf0]  ;;  %v3885_v26 = vor.u32 %v4540_v19, %v3884_v18  ;;  %1736 = vmatmul.bf16.vlgmr.msra.gmra.mxu1 %v4944_v17  ;;  %v4422_v15 = vld [vmem:[#allocation9 + $0x3e4] sm:$0xf] }
  0x4f   :  { %v3612_v25 = vld [vmem:[#allocation9 + $0x560] sm:$0xf]  ;;  %v4472_v27 = vld [vmem:[#allocation9 + $0x56c] sm:$0xf0]  ;;  %v3485_v32 = vor.u32 %v4440_v24, %v3484_v23  ;;  %1783 = vmatpush.bf16.msrb.mxu1 %v3629_v21  ;;  %1796 = vmatpush.bf16.msrb.mxu2 %v3757_v22  ;;  %v3422_v18 = vld [vmem:[#allocation9 + $0x3f0] sm:$0xf0]  ;;  %v3041_v21 = vor.u32 %v4326_v5, %v3038_v6 }
  0x50   :  { %v3740_v28 = vld [vmem:[#allocation9 + $0x660] sm:$0xf]  ;;  %v4504_v29 = vld [vmem:[#allocation9 + $0x66c] sm:$0xf0]  ;;  %v3613_v33 = vor.u32 %v4472_v27, %v3612_v25  ;;  %1809 = vmatpush.bf16.msrb.mxu3 %v3885_v26  ;;  %v134_v19 = vld [vmem:[#allocation4 + $0x30] sm:$0xff]  ;;  %v3169_v25 = vor.u32 %v4358_v7, %v3166_v10  ;;  %v3297_v26 = vor.u32 %v4390_v11, %v3294_v12 }
  0x51   :  { %v3868_v30 = vld [vmem:[#allocation9 + $0x760] sm:$0xf]  ;;  %v4536_v31 = vld [vmem:[#allocation9 + $0x76c] sm:$0xf0]  ;;  %v3741_v34 = vor.u32 %v4504_v29, %v3740_v28  ;;  %1771 = vmatpush.bf16.msrb.mxu0 %v3485_v32  ;;  %v4322_v22 = vld [vmem:[#allocation9 + $0xc4] sm:$0xf] }
  0x52   :  { %v3468_v35 = vld [vmem:[#allocation9 + $0x440] sm:$0xf]  ;;  %v4436_v36 = vld [vmem:[#allocation9 + $0x44c] sm:$0xf0]  ;;  %v3869_v38 = vor.u32 %v4536_v31, %v3868_v30  ;;  %v132_v23 = vld [vmem:[#allocation4 + $0x20] sm:$0xff]  ;;  %v3425_v30 = vor.u32 %v4422_v15, %v3422_v18 }
  0x53   :  { %v3596_v37 = vld [vmem:[#allocation9 + $0x540] sm:$0xf]  ;;  %v4468_v39 = vld [vmem:[#allocation9 + $0x54c] sm:$0xf0]  ;;  %v3469_v44 = vor.u32 %v4436_v36, %v3468_v35  ;;  %1784 = vmatpush.bf16.msrb.mxu1 %v3613_v33  ;;  %1797 = vmatpush.bf16.msrb.mxu2 %v3741_v34  ;;  %v3022_v27 = vld [vmem:[#allocation9 + $0xd0] sm:$0xf0]  ;;  %v4949_v34 = vpack.c.bf16 %v134_v19, %v134_v19 }
  0x54   :  { %v3724_v40 = vld [vmem:[#allocation9 + $0x640] sm:$0xf]  ;;  %v4500_v41 = vld [vmem:[#allocation9 + $0x64c] sm:$0xf0]  ;;  %v3597_v45 = vor.u32 %v4468_v39, %v3596_v37  ;;  %1810 = vmatpush.bf16.msrb.mxu3 %v3869_v38  ;;  %v4354_v28 = vld [vmem:[#allocation9 + $0x1c4] sm:$0xf]  ;;  %v4951_v37 = vpack.c.bf16 %v132_v23, %v132_v23  ;;  %v3025_v39 = vor.u32 %v4322_v22, %v3022_v27 }
  0x55   :  { %v3852_v42 = vld [vmem:[#allocation9 + $0x740] sm:$0xf]  ;;  %v4532_v43 = vld [vmem:[#allocation9 + $0x74c] sm:$0xf0]  ;;  %v3725_v46 = vor.u32 %v4500_v41, %v3724_v40  ;;  %1772 = vmatpush.bf16.msrb.mxu0 %v3469_v44  ;;  %v3150_v31 = vld [vmem:[#allocation9 + $0x1d0] sm:$0xf0] }
  0x56   :  { %v3452_v47 = vld [vmem:[#allocation9 + $0x420] sm:$0xf]  ;;  %v4432_v48 = vld [vmem:[#allocation9 + $0x42c] sm:$0xf0]  ;;  %v3853_v50 = vor.u32 %v4532_v43, %v3852_v42  ;;  %v4386_v32 = vld [vmem:[#allocation9 + $0x2c4] sm:$0xf]  ;;  %v3153_v41 = vor.u32 %v4354_v28, %v3150_v31 }
  0x57   :  { %v3580_v49 = vld [vmem:[#allocation9 + $0x520] sm:$0xf]  ;;  %v4464_v51 = vld [vmem:[#allocation9 + $0x52c] sm:$0xf0]  ;;  %v3453_v56 = vor.u32 %v4432_v48, %v3452_v47  ;;  %1785 = vmatpush.bf16.msrb.mxu1 %v3597_v45  ;;  %1798 = vmatpush.bf16.msrb.mxu2 %v3725_v46  ;;  %v3278_v33 = vld [vmem:[#allocation9 + $0x2d0] sm:$0xf0] }
  0x58   :  { %v3708_v52 = vld [vmem:[#allocation9 + $0x620] sm:$0xf]  ;;  %v4496_v53 = vld [vmem:[#allocation9 + $0x62c] sm:$0xf0]  ;;  %v3581_v59 = vor.u32 %v4464_v51, %v3580_v49  ;;  %1811 = vmatpush.bf16.msrb.mxu3 %v3853_v50  ;;  %v4418_v35 = vld [vmem:[#allocation9 + $0x3c4] sm:$0xf]  ;;  %v3281_v42 = vor.u32 %v4386_v32, %v3278_v33 }
  0x59   :  { %v3836_v54 = vld [vmem:[#allocation9 + $0x720] sm:$0xf]  ;;  %v4528_v55 = vld [vmem:[#allocation9 + $0x72c] sm:$0xf0]  ;;  %v3709_v60 = vor.u32 %v4496_v53, %v3708_v52  ;;  %1773 = vmatpush.bf16.msrb.mxu0 %v3453_v56  ;;  %v3406_v36 = vld [vmem:[#allocation9 + $0x3d0] sm:$0xf0] }
  0x5a   :  { %v3436_v57 = vld [vmem:[#allocation9 + $0x400] sm:$0xf]  ;;  %v4428_v58 = vld [vmem:[#allocation9 + $0x40c] sm:$0xf0]  ;;  %v3837_v1 = vor.u32 %v4528_v55, %v3836_v54  ;;  %v4318_v43 = vld [vmem:[#allocation9 + $0xa4] sm:$0xf]  ;;  %v3409_v46 = vor.u32 %v4418_v35, %v3406_v36 }
  0x5b   :  { %v3564_v61 = vld [vmem:[#allocation9 + $0x500] sm:$0xf]  ;;  %v4460_v62 = vld [vmem:[#allocation9 + $0x50c] sm:$0xf0]  ;;  %v3437_v8 = vor.u32 %v4428_v58, %v3436_v57  ;;  %1786 = vmatpush.bf16.msrb.mxu1 %v3581_v59  ;;  %1799 = vmatpush.bf16.msrb.mxu2 %v3709_v60  ;;  %v3006_v44 = vld [vmem:[#allocation9 + $0xb0] sm:$0xf0] }
  0x5c   :  { %v3692_v0 = vld [vmem:[#allocation9 + $0x600] sm:$0xf]  ;;  %v4492_v2 = vld [vmem:[#allocation9 + $0x60c] sm:$0xf0]  ;;  %v3565_v13 = vor.u32 %v4460_v62, %v3564_v61  ;;  %1812 = vmatpush.bf16.msrb.mxu3 %v3837_v1  ;;  %v4350_v45 = vld [vmem:[#allocation9 + $0x1a4] sm:$0xf]  ;;  %v3009_v52 = vor.u32 %v4318_v43, %v3006_v44 }
  0x5d   :  { %v3820_v3 = vld [vmem:[#allocation9 + $0x700] sm:$0xf]  ;;  %v4524_v4 = vld [vmem:[#allocation9 + $0x70c] sm:$0xf0]  ;;  %v3693_v14 = vor.u32 %v4492_v2, %v3692_v0  ;;  %1774 = vmatpush.bf16.msrb.mxu0 %v3437_v8  ;;  %v3134_v47 = vld [vmem:[#allocation9 + $0x1b0] sm:$0xf0] }
  0x5e   :  { %v3821_v20 = vor.u32 %v4524_v4, %v3820_v3  ;;  %v135_v24 = vld [vmem:[#allocation4 + $0x38] sm:$0xff]  ;;  %v133_v29 = vld [vmem:[#allocation4 + $0x28] sm:$0xff]  ;;  %v3137_v53 = vor.u32 %v4350_v45, %v3134_v47 }
  0x5f   :  { %1787 = vmatpush.bf16.msrb.mxu1 %v3565_v13  ;;  %1800 = vmatpush.bf16.msrb.mxu2 %v3693_v14  ;;  %v4953_v38 = vpack.c.bf16 %v135_v24, %v135_v24  ;;  %v4955_v40 = vpack.c.bf16 %v133_v29, %v133_v29  ;;  %v4382_v48 = vld [vmem:[#allocation9 + $0x2a4] sm:$0xf]  ;;  %v3262_v49 = vld [vmem:[#allocation9 + $0x2b0] sm:$0xf0] }
  0x60   :  { %1813 = vmatpush.bf16.msrb.mxu3 %v3821_v20  ;;  %1775 = vmatmul.bf16.vlgmr.msrb.gmra.mxu0 %v4951_v37  ;;  %v4414_v50 = vld [vmem:[#allocation9 + $0x3a4] sm:$0xf]  ;;  %v3390_v51 = vld [vmem:[#allocation9 + $0x3b0] sm:$0xf0]  ;;  %v3265_v54 = vor.u32 %v4382_v48, %v3262_v49 }
  0x61   :  { %1819 = vmatpush.bf16.msra.mxu0 %v3041_v21  ;;  %v4314_v55 = vld [vmem:[#allocation9 + $0x84] sm:$0xf]  ;;  %v2990_v56 = vld [vmem:[#allocation9 + $0x90] sm:$0xf0]  ;;  %v3393_v58 = vor.u32 %v4414_v50, %v3390_v51 }
  0x62   :  { %1801 = vmatmul.bf16.vlgmr.msrb.gmra.mxu2 %v4949_v34  ;;  %1788 = vmatmul.bf16.vlgmr.msrb.gmra.mxu1 %v4955_v40  ;;  %v4346_v57 = vld [vmem:[#allocation9 + $0x184] sm:$0xf]  ;;  %v3118_v59 = vld [vmem:[#allocation9 + $0x190] sm:$0xf0]  ;;  %v2993_v1 = vor.u32 %v4314_v55, %v2990_v56 }
  0x63   :  { %1832 = vmatpush.bf16.msra.mxu1 %v3169_v25  ;;  %1845 = vmatpush.bf16.msra.mxu2 %v3297_v26  ;;  %v4378_v60 = vld [vmem:[#allocation9 + $0x284] sm:$0xf]  ;;  %v3246_v61 = vld [vmem:[#allocation9 + $0x290] sm:$0xf0]  ;;  %v3121_v2 = vor.u32 %v4346_v57, %v3118_v59 }
  0x64   :  { %1858 = vmatpush.bf16.msra.mxu3 %v3425_v30  ;;  %v4410_v62 = vld [vmem:[#allocation9 + $0x384] sm:$0xf]  ;;  %v3374_v0 = vld [vmem:[#allocation9 + $0x390] sm:$0xf0]  ;;  %v3249_v3 = vor.u32 %v4378_v60, %v3246_v61 }
  0x65   :  { %1814 = vmatmul.bf16.vlgmr.msrb.gmra.mxu3 %v4953_v38  ;;  %1820 = vmatpush.bf16.msra.mxu0 %v3025_v39  ;;  %v4310_v4 = vld [vmem:[#allocation9 + $0x64] sm:$0xf]  ;;  %v2974_v5 = vld [vmem:[#allocation9 + $0x70] sm:$0xf0]  ;;  %v3377_v7 = vor.u32 %v4410_v62, %v3374_v0 }
  0x66   :  { %v4342_v6 = vld [vmem:[#allocation9 + $0x164] sm:$0xf]  ;;  %v3102_v8 = vld [vmem:[#allocation9 + $0x170] sm:$0xf0]  ;;  %v2977_v14 = vor.u32 %v4310_v4, %v2974_v5 }
  0x67   :  { %1833 = vmatpush.bf16.msra.mxu1 %v3153_v41  ;;  %1846 = vmatpush.bf16.msra.mxu2 %v3281_v42  ;;  %v4374_v10 = vld [vmem:[#allocation9 + $0x264] sm:$0xf]  ;;  %v3230_v11 = vld [vmem:[#allocation9 + $0x270] sm:$0xf0]  ;;  %v3105_v15 = vor.u32 %v4342_v6, %v3102_v8 }
  0x68   :  { %1859 = vmatpush.bf16.msra.mxu3 %v3409_v46  ;;  %v4406_v12 = vld [vmem:[#allocation9 + $0x364] sm:$0xf]  ;;  %v3358_v13 = vld [vmem:[#allocation9 + $0x370] sm:$0xf0]  ;;  %v3233_v18 = vor.u32 %v4374_v10, %v3230_v11 }
  0x69   :  { %1821 = vmatpush.bf16.msra.mxu0 %v3009_v52  ;;  %v4306_v19 = vld [vmem:[#allocation9 + $0x44] sm:$0xf]  ;;  %v2958_v20 = vld [vmem:[#allocation9 + $0x50] sm:$0xf0]  ;;  %v3361_v22 = vor.u32 %v4406_v12, %v3358_v13 }
  0x6a   :  { %v4338_v21 = vld [vmem:[#allocation9 + $0x144] sm:$0xf]  ;;  %v3086_v23 = vld [vmem:[#allocation9 + $0x150] sm:$0xf0]  ;;  %v2961_v28 = vor.u32 %v4306_v19, %v2958_v20 }
  0x6b   :  { %1834 = vmatpush.bf16.msra.mxu1 %v3137_v53  ;;  %1847 = vmatpush.bf16.msra.mxu2 %v3265_v54  ;;  %v4370_v24 = vld [vmem:[#allocation9 + $0x244] sm:$0xf]  ;;  %v3214_v25 = vld [vmem:[#allocation9 + $0x250] sm:$0xf0]  ;;  %v3089_v29 = vor.u32 %v4338_v21, %v3086_v23 }
  0x6c   :  { %1860 = vmatpush.bf16.msra.mxu3 %v3393_v58  ;;  %v4402_v26 = vld [vmem:[#allocation9 + $0x344] sm:$0xf]  ;;  %v3342_v27 = vld [vmem:[#allocation9 + $0x350] sm:$0xf0]  ;;  %v3217_v30 = vor.u32 %v4370_v24, %v3214_v25 }
  0x6d   :  { %1822 = vmatpush.bf16.msra.mxu0 %v2993_v1  ;;  %v4302_v31 = vld [vmem:[#allocation9 + $0x24] sm:$0xf]  ;;  %v2942_v32 = vld [vmem:[#allocation9 + $0x30] sm:$0xf0]  ;;  %v3345_v35 = vor.u32 %v4402_v26, %v3342_v27 }
  0x6e   :  { %v4334_v33 = vld [vmem:[#allocation9 + $0x124] sm:$0xf]  ;;  %v3070_v36 = vld [vmem:[#allocation9 + $0x130] sm:$0xf0]  ;;  %v2945_v44 = vor.u32 %v4302_v31, %v2942_v32 }
  0x6f   :  { %1835 = vmatpush.bf16.msra.mxu1 %v3121_v2  ;;  %1848 = vmatpush.bf16.msra.mxu2 %v3249_v3  ;;  %v4366_v39 = vld [vmem:[#allocation9 + $0x224] sm:$0xf]  ;;  %v3198_v41 = vld [vmem:[#allocation9 + $0x230] sm:$0xf0]  ;;  %v3073_v47 = vor.u32 %v4334_v33, %v3070_v36 }
  0x70   :  { %1861 = vmatpush.bf16.msra.mxu3 %v3377_v7  ;;  %v4398_v42 = vld [vmem:[#allocation9 + $0x324] sm:$0xf]  ;;  %v3326_v43 = vld [vmem:[#allocation9 + $0x330] sm:$0xf0]  ;;  %v3201_v48 = vor.u32 %v4366_v39, %v3198_v41 }
  0x71   :  { %1823 = vmatpush.bf16.msra.mxu0 %v2977_v14  ;;  %v4298_v45 = vld [vmem:[#allocation9 + $0x4] sm:$0xf]  ;;  %v2926_v46 = vld [vmem:[#allocation9 + $0x10] sm:$0xf0]  ;;  %v3329_v52 = vor.u32 %v4398_v42, %v3326_v43 }
  0x72   :  { %v4330_v49 = vld [vmem:[#allocation9 + $0x104] sm:$0xf]  ;;  %v3054_v50 = vld [vmem:[#allocation9 + $0x110] sm:$0xf0]  ;;  %v2929_v59 = vor.u32 %v4298_v45, %v2926_v46 }
  0x73   :  { %1836 = vmatpush.bf16.msra.mxu1 %v3105_v15  ;;  %1849 = vmatpush.bf16.msra.mxu2 %v3233_v18  ;;  %v4362_v51 = vld [vmem:[#allocation9 + $0x204] sm:$0xf]  ;;  %v3182_v53 = vld [vmem:[#allocation9 + $0x210] sm:$0xf0]  ;;  %v3057_v0 = vor.u32 %v4330_v49, %v3054_v50 }
  0x74   :  { %1862 = vmatpush.bf16.msra.mxu3 %v3361_v22  ;;  %v4394_v54 = vld [vmem:[#allocation9 + $0x304] sm:$0xf]  ;;  %v3310_v55 = vld [vmem:[#allocation9 + $0x310] sm:$0xf0]  ;;  %v3185_v1 = vor.u32 %v4362_v51, %v3182_v53 }
  0x75   :  { %1824 = vmatpush.bf16.msra.mxu0 %v2961_v28  ;;  %v4454_v56 = vld [vmem:[#allocation9 + $0x4e4] sm:$0xf]  ;;  %v3550_v57 = vld [vmem:[#allocation9 + $0x4f0] sm:$0xf0]  ;;  %v3313_v4 = vor.u32 %v4394_v54, %v3310_v55 }
  0x76   :  { %v4486_v58 = vld [vmem:[#allocation9 + $0x5e4] sm:$0xf]  ;;  %v3678_v60 = vld [vmem:[#allocation9 + $0x5f0] sm:$0xf0]  ;;  %v3553_v5 = vor.u32 %v4454_v56, %v3550_v57 }
  0x77   :  { %1837 = vmatpush.bf16.msra.mxu1 %v3089_v29  ;;  %1850 = vmatpush.bf16.msra.mxu2 %v3217_v30  ;;  %v4518_v61 = vld [vmem:[#allocation9 + $0x6e4] sm:$0xf]  ;;  %v3806_v62 = vld [vmem:[#allocation9 + $0x6f0] sm:$0xf0]  ;;  %v3681_v6 = vor.u32 %v4486_v58, %v3678_v60 }
  0x78   :  { %1863 = vmatpush.bf16.msra.mxu3 %v3345_v35  ;;  %v4550_v2 = vld [vmem:[#allocation9 + $0x7e4] sm:$0xf]  ;;  %v3934_v3 = vld [vmem:[#allocation9 + $0x7f0] sm:$0xf0]  ;;  %v3809_v7 = vor.u32 %v4518_v61, %v3806_v62 }
  0x79   :  { %1825 = vmatpush.bf16.msra.mxu0 %v2945_v44  ;;  %v4450_v8 = vld [vmem:[#allocation9 + $0x4c4] sm:$0xf]  ;;  %v3534_v10 = vld [vmem:[#allocation9 + $0x4d0] sm:$0xf0]  ;;  %v3937_v12 = vor.u32 %v4550_v2, %v3934_v3 }
  0x7a   :  { %v4482_v11 = vld [vmem:[#allocation9 + $0x5c4] sm:$0xf]  ;;  %v3662_v13 = vld [vmem:[#allocation9 + $0x5d0] sm:$0xf0]  ;;  %v3537_v20 = vor.u32 %v4450_v8, %v3534_v10 }
  0x7b   :  { %1838 = vmatpush.bf16.msra.mxu1 %v3073_v47  ;;  %1851 = vmatpush.bf16.msra.mxu2 %v3201_v48  ;;  %v4514_v14 = vld [vmem:[#allocation9 + $0x6c4] sm:$0xf]  ;;  %v3790_v15 = vld [vmem:[#allocation9 + $0x6d0] sm:$0xf0]  ;;  %v3665_v21 = vor.u32 %v4482_v11, %v3662_v13 }
  0x7c   :  { %1864 = vmatpush.bf16.msra.mxu3 %v3329_v52  ;;  %v4546_v18 = vld [vmem:[#allocation9 + $0x7c4] sm:$0xf]  ;;  %v3918_v19 = vld [vmem:[#allocation9 + $0x7d0] sm:$0xf0]  ;;  %v3793_v22 = vor.u32 %v4514_v14, %v3790_v15 }
  0x7d   :  { %1826 = vmatpush.bf16.msra.mxu0 %v2929_v59  ;;  %v4446_v23 = vld [vmem:[#allocation9 + $0x4a4] sm:$0xf]  ;;  %v3518_v24 = vld [vmem:[#allocation9 + $0x4b0] sm:$0xf0]  ;;  %v3921_v26 = vor.u32 %v4546_v18, %v3918_v19 }
  0x7e   :  { %v4478_v25 = vld [vmem:[#allocation9 + $0x5a4] sm:$0xf]  ;;  %v3646_v27 = vld [vmem:[#allocation9 + $0x5b0] sm:$0xf0]  ;;  %v3521_v32 = vor.u32 %v4446_v23, %v3518_v24 }
  0x7f   :  { %1839 = vmatpush.bf16.msra.mxu1 %v3057_v0  ;;  %1852 = vmatpush.bf16.msra.mxu2 %v3185_v1  ;;  %v4510_v28 = vld [vmem:[#allocation9 + $0x6a4] sm:$0xf]  ;;  %v3774_v29 = vld [vmem:[#allocation9 + $0x6b0] sm:$0xf0]  ;;  %v3649_v33 = vor.u32 %v4478_v25, %v3646_v27 }
  0x80   :  { %1865 = vmatpush.bf16.msra.mxu3 %v3313_v4  ;;  %v4542_v30 = vld [vmem:[#allocation9 + $0x7a4] sm:$0xf]  ;;  %v3902_v31 = vld [vmem:[#allocation9 + $0x7b0] sm:$0xf0]  ;;  %1827 = vmatmul.bf16.vlgmr.msra.gmra.mxu0 %v4940_v9  ;;  %v3777_v35 = vor.u32 %v4510_v28, %v3774_v29 }
  0x81   :  { %1871 = vmatpush.bf16.msrb.mxu0 %v3553_v5  ;;  %v4442_v36 = vld [vmem:[#allocation9 + $0x484] sm:$0xf]  ;;  %v3502_v39 = vld [vmem:[#allocation9 + $0x490] sm:$0xf0]  ;;  %v3905_v42 = vor.u32 %v4542_v30, %v3902_v31 }
  0x82   :  { %1853 = vmatmul.bf16.vlgmr.msra.gmra.mxu2 %v4937_v63  ;;  %1840 = vmatmul.bf16.vlgmr.msra.gmra.mxu1 %v4944_v17  ;;  %v4474_v41 = vld [vmem:[#allocation9 + $0x584] sm:$0xf]  ;;  %v3630_v43 = vld [vmem:[#allocation9 + $0x590] sm:$0xf0]  ;;  %v3505_v48 = vor.u32 %v4442_v36, %v3502_v39  ;;  %v3044_v39 = vld [vmem:[#allocation9 + $0xe8] sm:$0xf] }
  0x83   :  { %1884 = vmatpush.bf16.msrb.mxu1 %v3681_v6  ;;  %1897 = vmatpush.bf16.msrb.mxu2 %v3809_v7  ;;  %v4506_v44 = vld [vmem:[#allocation9 + $0x684] sm:$0xf]  ;;  %v3758_v45 = vld [vmem:[#allocation9 + $0x690] sm:$0xf0]  ;;  %v3633_v49 = vor.u32 %v4474_v41, %v3630_v43  ;;  %v4329_v41 = vld [vmem:[#allocation9 + $0xf4] sm:$0xf0] }
  0x84   :  { %1910 = vmatpush.bf16.msrb.mxu3 %v3937_v12  ;;  %v4538_v46 = vld [vmem:[#allocation9 + $0x784] sm:$0xf]  ;;  %v3886_v47 = vld [vmem:[#allocation9 + $0x790] sm:$0xf0]  ;;  %v3761_v50 = vor.u32 %v4506_v44, %v3758_v45  ;;  %v4361_v44 = vld [vmem:[#allocation9 + $0x1f4] sm:$0xf0] }
  0x85   :  { %1866 = vmatmul.bf16.vlgmr.msra.gmra.mxu3 %v4942_v16  ;;  %1872 = vmatpush.bf16.msrb.mxu0 %v3537_v20  ;;  %v4438_v51 = vld [vmem:[#allocation9 + $0x464] sm:$0xf]  ;;  %v3486_v52 = vld [vmem:[#allocation9 + $0x470] sm:$0xf0]  ;;  %v3889_v54 = vor.u32 %v4538_v46, %v3886_v47  ;;  %v3300_v45 = vld [vmem:[#allocation9 + $0x2e8] sm:$0xf] }
  0x86   :  { %v4470_v53 = vld [vmem:[#allocation9 + $0x564] sm:$0xf]  ;;  %v3614_v55 = vld [vmem:[#allocation9 + $0x570] sm:$0xf0]  ;;  %v3489_v60 = vor.u32 %v4438_v51, %v3486_v52  ;;  %v4393_v46 = vld [vmem:[#allocation9 + $0x2f4] sm:$0xf0]  ;;  %v3045_v52 = vor.u32 %v4329_v41, %v3044_v39 }
  0x87   :  { %1885 = vmatpush.bf16.msrb.mxu1 %v3665_v21  ;;  %1898 = vmatpush.bf16.msrb.mxu2 %v3793_v22  ;;  %v4502_v56 = vld [vmem:[#allocation9 + $0x664] sm:$0xf]  ;;  %v3742_v57 = vld [vmem:[#allocation9 + $0x670] sm:$0xf0]  ;;  %v3617_v61 = vor.u32 %v4470_v53, %v3614_v55  ;;  %v3028_v55 = vld [vmem:[#allocation9 + $0xc8] sm:$0xf] }
  0x88   :  { %1911 = vmatpush.bf16.msrb.mxu3 %v3921_v26  ;;  %v4534_v58 = vld [vmem:[#allocation9 + $0x764] sm:$0xf]  ;;  %v3870_v59 = vld [vmem:[#allocation9 + $0x770] sm:$0xf0]  ;;  %v3745_v62 = vor.u32 %v4502_v56, %v3742_v57  ;;  %v4325_v56 = vld [vmem:[#allocation9 + $0xd4] sm:$0xf0] }
  0x89   :  { %1873 = vmatpush.bf16.msrb.mxu0 %v3521_v32  ;;  %v4434_v0 = vld [vmem:[#allocation9 + $0x444] sm:$0xf]  ;;  %v3470_v1 = vld [vmem:[#allocation9 + $0x450] sm:$0xf0]  ;;  %v3873_v3 = vor.u32 %v4534_v58, %v3870_v59  ;;  %v3156_v57 = vld [vmem:[#allocation9 + $0x1c8] sm:$0xf] }
  0x8a   :  { %v4466_v2 = vld [vmem:[#allocation9 + $0x544] sm:$0xf]  ;;  %v3598_v4 = vld [vmem:[#allocation9 + $0x550] sm:$0xf0]  ;;  %v3473_v10 = vor.u32 %v4434_v0, %v3470_v1  ;;  %v4357_v59 = vld [vmem:[#allocation9 + $0x1d4] sm:$0xf0]  ;;  %v3029_v1 = vor.u32 %v4325_v56, %v3028_v55 }
  0x8b   :  { %1886 = vmatpush.bf16.msrb.mxu1 %v3649_v33  ;;  %1899 = vmatpush.bf16.msrb.mxu2 %v3777_v35  ;;  %v4498_v5 = vld [vmem:[#allocation9 + $0x644] sm:$0xf]  ;;  %v3726_v6 = vld [vmem:[#allocation9 + $0x650] sm:$0xf0]  ;;  %v3601_v11 = vor.u32 %v4466_v2, %v3598_v4  ;;  %v4421_v0 = vld [vmem:[#allocation9 + $0x3d4] sm:$0xf0]  ;;  %v3157_v2 = vor.u32 %v4357_v59, %v3156_v57 }
  0x8c   :  { %1912 = vmatpush.bf16.msrb.mxu3 %v3905_v42  ;;  %v4530_v7 = vld [vmem:[#allocation9 + $0x744] sm:$0xf]  ;;  %v3854_v8 = vld [vmem:[#allocation9 + $0x750] sm:$0xf0]  ;;  %v3729_v12 = vor.u32 %v4498_v5, %v3726_v6  ;;  %v3172_v42 = vld [vmem:[#allocation9 + $0x1e8] sm:$0xf] }
  0x8d   :  { %1874 = vmatpush.bf16.msrb.mxu0 %v3505_v48  ;;  %v4430_v13 = vld [vmem:[#allocation9 + $0x424] sm:$0xf]  ;;  %v3454_v14 = vld [vmem:[#allocation9 + $0x430] sm:$0xf0]  ;;  %v3857_v18 = vor.u32 %v4530_v7, %v3854_v8  ;;  %v3173_v53 = vor.u32 %v4361_v44, %v3172_v42  ;;  %v3012_v4 = vld [vmem:[#allocation9 + $0xa8] sm:$0xf] }
  0x8e   :  { %v4462_v15 = vld [vmem:[#allocation9 + $0x524] sm:$0xf]  ;;  %v3582_v19 = vld [vmem:[#allocation9 + $0x530] sm:$0xf0]  ;;  %v3457_v24 = vor.u32 %v4430_v13, %v3454_v14  ;;  %v4321_v5 = vld [vmem:[#allocation9 + $0xb4] sm:$0xf0] }
  0x8f   :  { %1887 = vmatpush.bf16.msrb.mxu1 %v3633_v49  ;;  %1900 = vmatpush.bf16.msrb.mxu2 %v3761_v50  ;;  %v4494_v20 = vld [vmem:[#allocation9 + $0x624] sm:$0xf]  ;;  %v3710_v21 = vld [vmem:[#allocation9 + $0x630] sm:$0xf0]  ;;  %v3585_v27 = vor.u32 %v4462_v15, %v3582_v19  ;;  %v3428_v49 = vld [vmem:[#allocation9 + $0x3e8] sm:$0xf]  ;;  %v3013_v14 = vor.u32 %v4321_v5, %v3012_v4 }
  0x90   :  { %1913 = vmatpush.bf16.msrb.mxu3 %v3889_v54  ;;  %v4526_v22 = vld [vmem:[#allocation9 + $0x724] sm:$0xf]  ;;  %v3838_v23 = vld [vmem:[#allocation9 + $0x730] sm:$0xf0]  ;;  %v3713_v28 = vor.u32 %v4494_v20, %v3710_v21  ;;  %v4425_v50 = vld [vmem:[#allocation9 + $0x3f4] sm:$0xf0]  ;;  %v3301_v54 = vor.u32 %v4393_v46, %v3300_v45 }
  0x91   :  { %1875 = vmatpush.bf16.msrb.mxu0 %v3489_v60  ;;  %v4426_v25 = vld [vmem:[#allocation9 + $0x404] sm:$0xf]  ;;  %v3438_v26 = vld [vmem:[#allocation9 + $0x410] sm:$0xf0]  ;;  %v3841_v32 = vor.u32 %v4526_v22, %v3838_v23  ;;  %v3429_v58 = vor.u32 %v4425_v50, %v3428_v49  ;;  %v3284_v60 = vld [vmem:[#allocation9 + $0x2c8] sm:$0xf] }
  0x92   :  { %v4458_v29 = vld [vmem:[#allocation9 + $0x504] sm:$0xf]  ;;  %v3566_v30 = vld [vmem:[#allocation9 + $0x510] sm:$0xf0]  ;;  %v3441_v43 = vor.u32 %v4426_v25, %v3438_v26  ;;  %v3140_v6 = vld [vmem:[#allocation9 + $0x1a8] sm:$0xf] }
  0x93   :  { %1888 = vmatpush.bf16.msrb.mxu1 %v3617_v61  ;;  %1901 = vmatpush.bf16.msrb.mxu2 %v3745_v62  ;;  %v4490_v31 = vld [vmem:[#allocation9 + $0x604] sm:$0xf]  ;;  %v3694_v33 = vld [vmem:[#allocation9 + $0x610] sm:$0xf0]  ;;  %v3569_v47 = vor.u32 %v4458_v29, %v3566_v30  ;;  %v4389_v61 = vld [vmem:[#allocation9 + $0x2d4] sm:$0xf0] }
  0x94   :  { %1914 = vmatpush.bf16.msrb.mxu3 %v3873_v3  ;;  %v4522_v35 = vld [vmem:[#allocation9 + $0x704] sm:$0xf]  ;;  %v3822_v36 = vld [vmem:[#allocation9 + $0x710] sm:$0xf0]  ;;  %v3697_v48 = vor.u32 %v4490_v31, %v3694_v33  ;;  %v3412_v62 = vld [vmem:[#allocation9 + $0x3c8] sm:$0xf]  ;;  %v3285_v3 = vor.u32 %v4389_v61, %v3284_v60 }
  0x95   :  { %1876 = vmatpush.bf16.msrb.mxu0 %v3473_v10  ;;  %v3825_v51 = vor.u32 %v4522_v35, %v3822_v36  ;;  %v3413_v7 = vor.u32 %v4421_v0, %v3412_v62  ;;  %v4353_v8 = vld [vmem:[#allocation9 + $0x1b4] sm:$0xf0]  ;;  %v3268_v10 = vld [vmem:[#allocation9 + $0x2a8] sm:$0xf] }
  0x96   :  { %v4417_v13 = vld [vmem:[#allocation9 + $0x3b4] sm:$0xf0]  ;;  %v3141_v15 = vor.u32 %v4353_v8, %v3140_v6  ;;  %v2996_v19 = vld [vmem:[#allocation9 + $0x88] sm:$0xf] }
  0x97   :  { %1889 = vmatpush.bf16.msrb.mxu1 %v3601_v11  ;;  %1902 = vmatpush.bf16.msrb.mxu2 %v3729_v12  ;;  %v4385_v11 = vld [vmem:[#allocation9 + $0x2b4] sm:$0xf0]  ;;  %v3396_v12 = vld [vmem:[#allocation9 + $0x3a8] sm:$0xf] }
  0x98   :  { %1915 = vmatpush.bf16.msrb.mxu3 %v3857_v18  ;;  %v3269_v18 = vor.u32 %v4385_v11, %v3268_v10  ;;  %v4317_v20 = vld [vmem:[#allocation9 + $0x94] sm:$0xf0]  ;;  %v3124_v21 = vld [vmem:[#allocation9 + $0x188] sm:$0xf]  ;;  %v3397_v22 = vor.u32 %v4417_v13, %v3396_v12 }
  0x99   :  { %1877 = vmatpush.bf16.msrb.mxu0 %v3457_v24  ;;  %v4349_v23 = vld [vmem:[#allocation9 + $0x194] sm:$0xf0]  ;;  %v3252_v24 = vld [vmem:[#allocation9 + $0x288] sm:$0xf] }
  0x9a   :  { %v4381_v25 = vld [vmem:[#allocation9 + $0x294] sm:$0xf0]  ;;  %v3380_v26 = vld [vmem:[#allocation9 + $0x388] sm:$0xf]  ;;  %v3125_v29 = vor.u32 %v4349_v23, %v3124_v21 }
  0x9b   :  { %1890 = vmatpush.bf16.msrb.mxu1 %v3585_v27  ;;  %1903 = vmatpush.bf16.msrb.mxu2 %v3713_v28  ;;  %v4413_v27 = vld [vmem:[#allocation9 + $0x394] sm:$0xf0]  ;;  %v2997_v28 = vor.u32 %v4317_v20, %v2996_v19  ;;  %v3253_v30 = vor.u32 %v4381_v25, %v3252_v24  ;;  %v2980_v31 = vld [vmem:[#allocation9 + $0x68] sm:$0xf] }
  0x9c   :  { %1916 = vmatpush.bf16.msrb.mxu3 %v3841_v32  ;;  %v4313_v32 = vld [vmem:[#allocation9 + $0x74] sm:$0xf0]  ;;  %v3108_v33 = vld [vmem:[#allocation9 + $0x168] sm:$0xf]  ;;  %v3381_v35 = vor.u32 %v4413_v27, %v3380_v26 }
  0x9d   :  { %1878 = vmatpush.bf16.msrb.mxu0 %v3441_v43  ;;  %v4345_v36 = vld [vmem:[#allocation9 + $0x174] sm:$0xf0]  ;;  %v3236_v39 = vld [vmem:[#allocation9 + $0x268] sm:$0xf]  ;;  %v2981_v44 = vor.u32 %v4313_v32, %v2980_v31 }
  0x9e   :  { %v4377_v41 = vld [vmem:[#allocation9 + $0x274] sm:$0xf0]  ;;  %v3364_v42 = vld [vmem:[#allocation9 + $0x368] sm:$0xf]  ;;  %v3109_v45 = vor.u32 %v4345_v36, %v3108_v33 }
  0x9f   :  { %1891 = vmatpush.bf16.msrb.mxu1 %v3569_v47  ;;  %1904 = vmatpush.bf16.msrb.mxu2 %v3697_v48  ;;  %v4409_v43 = vld [vmem:[#allocation9 + $0x374] sm:$0xf0]  ;;  %v3237_v46 = vor.u32 %v4377_v41, %v3236_v39  ;;  %v2964_v47 = vld [vmem:[#allocation9 + $0x48] sm:$0xf] }
  0xa0   :  { %1917 = vmatpush.bf16.msrb.mxu3 %v3825_v51  ;;  %1879 = vmatmul.bf16.vlgmr.msrb.gmra.mxu0 %v4951_v37  ;;  %v4309_v48 = vld [vmem:[#allocation9 + $0x54] sm:$0xf0]  ;;  %v3092_v49 = vld [vmem:[#allocation9 + $0x148] sm:$0xf]  ;;  %v3365_v50 = vor.u32 %v4409_v43, %v3364_v42 }
  0xa1   :  { %1923 = vmatpush.bf16.msra.mxu0 %v3045_v52  ;;  %v4341_v51 = vld [vmem:[#allocation9 + $0x154] sm:$0xf0]  ;;  %v3220_v52 = vld [vmem:[#allocation9 + $0x248] sm:$0xf]  ;;  %v2965_v56 = vor.u32 %v4309_v48, %v2964_v47 }
  0xa2   :  { %1905 = vmatmul.bf16.vlgmr.msrb.gmra.mxu2 %v4949_v34  ;;  %1892 = vmatmul.bf16.vlgmr.msrb.gmra.mxu1 %v4955_v40  ;;  %v4405_v55 = vld [vmem:[#allocation9 + $0x354] sm:$0xf0]  ;;  %v3093_v57 = vor.u32 %v4341_v51, %v3092_v49  ;;  %v2948_v59 = vld [vmem:[#allocation9 + $0x28] sm:$0xf] }
  0xa3   :  { %1936 = vmatpush.bf16.msra.mxu1 %v3173_v53  ;;  %1949 = vmatpush.bf16.msra.mxu2 %v3301_v54  ;;  %v4373_v53 = vld [vmem:[#allocation9 + $0x254] sm:$0xf0]  ;;  %v3348_v54 = vld [vmem:[#allocation9 + $0x348] sm:$0xf] }
  0xa4   :  { %1962 = vmatpush.bf16.msra.mxu3 %v3429_v58  ;;  %v3221_v58 = vor.u32 %v4373_v53, %v3220_v52  ;;  %v4305_v60 = vld [vmem:[#allocation9 + $0x34] sm:$0xf0]  ;;  %v3076_v61 = vld [vmem:[#allocation9 + $0x128] sm:$0xf]  ;;  %v3349_v62 = vor.u32 %v4405_v55, %v3348_v54 }
  0xa5   :  { %1918 = vmatmul.bf16.vlgmr.msrb.gmra.mxu3 %v4953_v38  ;;  %1924 = vmatpush.bf16.msra.mxu0 %v3029_v1  ;;  %v4337_v0 = vld [vmem:[#allocation9 + $0x134] sm:$0xf0]  ;;  %v3204_v1 = vld [vmem:[#allocation9 + $0x228] sm:$0xf]  ;;  %v2949_v5 = vor.u32 %v4305_v60, %v2948_v59 }
  0xa6   :  { %v4401_v4 = vld [vmem:[#allocation9 + $0x334] sm:$0xf0]  ;;  %v2932_v6 = vld [vmem:[#allocation9 + $0x8] sm:$0xf]  ;;  %v3077_v8 = vor.u32 %v4337_v0, %v3076_v61 }
  0xa7   :  { %1937 = vmatpush.bf16.msra.mxu1 %v3157_v2  ;;  %1950 = vmatpush.bf16.msra.mxu2 %v3285_v3  ;;  %v4369_v2 = vld [vmem:[#allocation9 + $0x234] sm:$0xf0]  ;;  %v3332_v3 = vld [vmem:[#allocation9 + $0x328] sm:$0xf] }
  0xa8   :  { %1963 = vmatpush.bf16.msra.mxu3 %v3413_v7  ;;  %v4301_v7 = vld [vmem:[#allocation9 + $0x14] sm:$0xf0]  ;;  %v3205_v10 = vor.u32 %v4369_v2, %v3204_v1  ;;  %v3060_v11 = vld [vmem:[#allocation9 + $0x108] sm:$0xf] }
  0xa9   :  { %1925 = vmatpush.bf16.msra.mxu0 %v3013_v14  ;;  %v4333_v12 = vld [vmem:[#allocation9 + $0x114] sm:$0xf0]  ;;  %v3188_v13 = vld [vmem:[#allocation9 + $0x208] sm:$0xf]  ;;  %v3333_v14 = vor.u32 %v4401_v4, %v3332_v3  ;;  %v2933_v23 = vor.u32 %v4301_v7, %v2932_v6 }
  0xaa   :  { %v4397_v19 = vld [vmem:[#allocation9 + $0x314] sm:$0xf0]  ;;  %v3556_v20 = vld [vmem:[#allocation9 + $0x4e8] sm:$0xf]  ;;  %v3061_v27 = vor.u32 %v4333_v12, %v3060_v11 }
  0xab   :  { %1938 = vmatpush.bf16.msra.mxu1 %v3141_v15  ;;  %1951 = vmatpush.bf16.msra.mxu2 %v3269_v18  ;;  %v4365_v15 = vld [vmem:[#allocation9 + $0x214] sm:$0xf0]  ;;  %v3316_v18 = vld [vmem:[#allocation9 + $0x308] sm:$0xf] }
  0xac   :  { %1964 = vmatpush.bf16.msra.mxu3 %v3397_v22  ;;  %v4457_v21 = vld [vmem:[#allocation9 + $0x4f4] sm:$0xf0]  ;;  %v3684_v22 = vld [vmem:[#allocation9 + $0x5e8] sm:$0xf]  ;;  %v3317_v31 = vor.u32 %v4397_v19, %v3316_v18 }
  0xad   :  { %1926 = vmatpush.bf16.msra.mxu0 %v2997_v28  ;;  %v4489_v24 = vld [vmem:[#allocation9 + $0x5f4] sm:$0xf0]  ;;  %v3812_v25 = vld [vmem:[#allocation9 + $0x6e8] sm:$0xf]  ;;  %v3189_v28 = vor.u32 %v4365_v15, %v3188_v13  ;;  %v3557_v32 = vor.u32 %v4457_v21, %v3556_v20 }
  0xae   :  { %v4521_v26 = vld [vmem:[#allocation9 + $0x6f4] sm:$0xf0]  ;;  %v3685_v33 = vor.u32 %v4489_v24, %v3684_v22  ;;  %v3540_v36 = vld [vmem:[#allocation9 + $0x4c8] sm:$0xf] }
  0xaf   :  { %1939 = vmatpush.bf16.msra.mxu1 %v3125_v29  ;;  %1952 = vmatpush.bf16.msra.mxu2 %v3253_v30  ;;  %v3940_v29 = vld [vmem:[#allocation9 + $0x7e8] sm:$0xf]  ;;  %v4553_v30 = vld [vmem:[#allocation9 + $0x7f4] sm:$0xf0] }
  0xb0   :  { %1965 = vmatpush.bf16.msra.mxu3 %v3381_v35  ;;  %v3813_v35 = vor.u32 %v4521_v26, %v3812_v25  ;;  %v4453_v39 = vld [vmem:[#allocation9 + $0x4d4] sm:$0xf0]  ;;  %v3668_v41 = vld [vmem:[#allocation9 + $0x5c8] sm:$0xf]  ;;  %v3941_v42 = vor.u32 %v4553_v30, %v3940_v29 }
  0xb1   :  { %1927 = vmatpush.bf16.msra.mxu0 %v2981_v44  ;;  %v4485_v43 = vld [vmem:[#allocation9 + $0x5d4] sm:$0xf0]  ;;  %v3796_v44 = vld [vmem:[#allocation9 + $0x6c8] sm:$0xf]  ;;  %v3541_v48 = vor.u32 %v4453_v39, %v3540_v36 }
  0xb2   :  { %v4549_v47 = vld [vmem:[#allocation9 + $0x7d4] sm:$0xf0]  ;;  %v3669_v49 = vor.u32 %v4485_v43, %v3668_v41  ;;  %v3524_v51 = vld [vmem:[#allocation9 + $0x4a8] sm:$0xf] }
  0xb3   :  { %1940 = vmatpush.bf16.msra.mxu1 %v3109_v45  ;;  %1953 = vmatpush.bf16.msra.mxu2 %v3237_v46  ;;  %v4517_v45 = vld [vmem:[#allocation9 + $0x6d4] sm:$0xf0]  ;;  %v3924_v46 = vld [vmem:[#allocation9 + $0x7c8] sm:$0xf] }
  0xb4   :  { %1966 = vmatpush.bf16.msra.mxu3 %v3365_v50  ;;  %v3797_v50 = vor.u32 %v4517_v45, %v3796_v44  ;;  %v4449_v52 = vld [vmem:[#allocation9 + $0x4b4] sm:$0xf0]  ;;  %v3652_v53 = vld [vmem:[#allocation9 + $0x5a8] sm:$0xf]  ;;  %v3925_v54 = vor.u32 %v4549_v47, %v3924_v46 }
  0xb5   :  { %1928 = vmatpush.bf16.msra.mxu0 %v2965_v56  ;;  %v4481_v55 = vld [vmem:[#allocation9 + $0x5b4] sm:$0xf0]  ;;  %v3780_v56 = vld [vmem:[#allocation9 + $0x6a8] sm:$0xf]  ;;  %v3525_v60 = vor.u32 %v4449_v52, %v3524_v51 }
  0xb6   :  { %v4545_v59 = vld [vmem:[#allocation9 + $0x7b4] sm:$0xf0]  ;;  %v3508_v61 = vld [vmem:[#allocation9 + $0x488] sm:$0xf] }
  0xb7   :  { %1941 = vmatpush.bf16.msra.mxu1 %v3093_v57  ;;  %1954 = vmatpush.bf16.msra.mxu2 %v3221_v58  ;;  %v4513_v57 = vld [vmem:[#allocation9 + $0x6b4] sm:$0xf0]  ;;  %v3908_v58 = vld [vmem:[#allocation9 + $0x7a8] sm:$0xf] }
  0xb8   :  { %1967 = vmatpush.bf16.msra.mxu3 %v3349_v62  ;;  %v3653_v62 = vor.u32 %v4481_v55, %v3652_v53  ;;  %v3781_v0 = vor.u32 %v4513_v57, %v3780_v56  ;;  %v4445_v1 = vld [vmem:[#allocation9 + $0x494] sm:$0xf0]  ;;  %v3636_v2 = vld [vmem:[#allocation9 + $0x588] sm:$0xf]  ;;  %v3909_v4 = vor.u32 %v4545_v59, %v3908_v58 }
  0xb9   :  { %1929 = vmatpush.bf16.msra.mxu0 %v2949_v5  ;;  %v4477_v3 = vld [vmem:[#allocation9 + $0x594] sm:$0xf0]  ;;  %v3764_v5 = vld [vmem:[#allocation9 + $0x688] sm:$0xf]  ;;  %v3509_v11 = vor.u32 %v4445_v1, %v3508_v61 }
  0xba   :  { %v4509_v6 = vld [vmem:[#allocation9 + $0x694] sm:$0xf0]  ;;  %v3492_v12 = vld [vmem:[#allocation9 + $0x468] sm:$0xf]  ;;  %v3637_v13 = vor.u32 %v4477_v3, %v3636_v2 }
  0xbb   :  { %1942 = vmatpush.bf16.msra.mxu1 %v3077_v8  ;;  %1955 = vmatpush.bf16.msra.mxu2 %v3205_v10  ;;  %v4976_v7 = vld [vmem:[%s5050_s4] sm:$0xf]  ;;  %v3892_v8 = vld [vmem:[#allocation9 + $0x788] sm:$0xf] }
  0xbc   :  { %1968 = vmatpush.bf16.msra.mxu3 %v3333_v14  ;;  %v4541_v10 = vld [vmem:[#allocation9 + $0x794] sm:$0xf0]  ;;  %v3765_v14 = vor.u32 %v4509_v6, %v3764_v5  ;;  %v3620_v18 = vld [vmem:[#allocation9 + $0x568] sm:$0xf]  ;;  %v427_v19 = vperm.slane %v4976_v7, 0 }
  0xbd   :  { %1930 = vmatpush.bf16.msra.mxu0 %v2933_v23  ;;  %v4441_v15 = vld [vmem:[#allocation9 + $0x474] sm:$0xf0]  ;;  %v3893_v20 = vor.u32 %v4541_v10, %v3892_v8  ;;  %v3748_v22 = vld [vmem:[#allocation9 + $0x668] sm:$0xf] }
  0xbe   :  { %v4473_v21 = vld [vmem:[#allocation9 + $0x574] sm:$0xf0]  ;;  %v3876_v24 = vld [vmem:[#allocation9 + $0x768] sm:$0xf]  ;;  %v3493_v26 = vor.u32 %v4441_v15, %v3492_v12  ;;  %v3046_v15 = vld [vmem:[#allocation9 + $0xf8] sm:$0xf0] }
  0xbf   :  { %1943 = vmatpush.bf16.msra.mxu1 %v3061_v27  ;;  %1956 = vmatpush.bf16.msra.mxu2 %v3189_v28  ;;  %v4505_v23 = vld [vmem:[#allocation9 + $0x674] sm:$0xf0]  ;;  %v1724_v27 = vpop.f32.mrf.mxu0  ;;  %v3621_v28 = vor.u32 %v4473_v21, %v3620_v18  ;;  %v3476_v30 = vld [vmem:[#allocation9 + $0x448] sm:$0xf]  ;;  %v4359_v18 = vld [vmem:[#allocation9 + $0x1ec] sm:$0xf] }
  0xc0   :  { %1969 = vmatpush.bf16.msra.mxu3 %v3317_v31  ;;  %1931 = vmatmul.bf16.vlgmr.msra.gmra.mxu0 %v4940_v9  ;;  %v4537_v25 = vld [vmem:[#allocation9 + $0x774] sm:$0xf0]  ;;  %v3749_v29 = vor.u32 %v4505_v23, %v3748_v22  ;;  %v3732_v39 = vld [vmem:[#allocation9 + $0x648] sm:$0xf]  ;;  %v3174_v22 = vld [vmem:[#allocation9 + $0x1f8] sm:$0xf0] }
  0xc1   :  { %1975 = vmatpush.bf16.msrb.mxu0 %v3557_v32  ;;  %v4437_v31 = vld [vmem:[#allocation9 + $0x454] sm:$0xf0]  ;;  %v3604_v32 = vld [vmem:[#allocation9 + $0x548] sm:$0xf]  ;;  %v4391_v23 = vld [vmem:[#allocation9 + $0x2ec] sm:$0xf] }
  0xc2   :  { %1957 = vmatmul.bf16.vlgmr.msra.gmra.mxu2 %v4937_v63  ;;  %1944 = vmatmul.bf16.vlgmr.msra.gmra.mxu1 %v4944_v17  ;;  %v4469_v36 = vld [vmem:[#allocation9 + $0x554] sm:$0xf0]  ;;  %v3477_v46 = vor.u32 %v4437_v31, %v3476_v30  ;;  %v3588_v52 = vld [vmem:[#allocation9 + $0x528] sm:$0xf]  ;;  %v3177_v31 = vor.u32 %v4359_v18, %v3174_v22  ;;  %v2982_v18 = vld [vmem:[#allocation9 + $0x78] sm:$0xf0] }
  0xc3   :  { %1988 = vmatpush.bf16.msrb.mxu1 %v3685_v33  ;;  %2001 = vmatpush.bf16.msrb.mxu2 %v3813_v35  ;;  %v1725_v33 = vadd.f32 %v1724_v27, %v427_v19  ;;  %v3877_v35 = vor.u32 %v4537_v25, %v3876_v24  ;;  %v4501_v41 = vld [vmem:[#allocation9 + $0x654] sm:$0xf0]  ;;  %v3716_v55 = vld [vmem:[#allocation9 + $0x628] sm:$0xf]  ;;  %v3302_v24 = vld [vmem:[#allocation9 + $0x2f8] sm:$0xf0] }
  0xc4   :  { %2014 = vmatpush.bf16.msrb.mxu3 %v3941_v42  ;;  %v3860_v42 = vld [vmem:[#allocation9 + $0x748] sm:$0xf]  ;;  %v4533_v43 = vld [vmem:[#allocation9 + $0x754] sm:$0xf0]  ;;  %v1750_v45 = vpop.f32.mrf.mxu2  ;;  %v4423_v27 = vld [vmem:[#allocation9 + $0x3ec] sm:$0xf] }
  0xc5   :  { %1970 = vmatmul.bf16.vlgmr.msra.gmra.mxu3 %v4942_v16  ;;  %1976 = vmatpush.bf16.msrb.mxu0 %v3541_v48  ;;  %v3605_v48 = vor.u32 %v4469_v36, %v3604_v32  ;;  %v4433_v51 = vld [vmem:[#allocation9 + $0x434] sm:$0xf0]  ;;  %v3861_v53 = vor.u32 %v4533_v43, %v3860_v42  ;;  %v3844_v58 = vld [vmem:[#allocation9 + $0x728] sm:$0xf]  ;;  %v3305_v32 = vor.u32 %v4391_v23, %v3302_v24  ;;  %v4355_v36 = vld [vmem:[#allocation9 + $0x1cc] sm:$0xf] }
  0xc6   :  { %v4497_v56 = vld [vmem:[#allocation9 + $0x634] sm:$0xf0]  ;;  %v3572_v5 = vld [vmem:[#allocation9 + $0x508] sm:$0xf]  ;;  %v3158_v42 = vld [vmem:[#allocation9 + $0x1d8] sm:$0xf0] }
  0xc7   :  { %1989 = vmatpush.bf16.msrb.mxu1 %v3669_v49  ;;  %2002 = vmatpush.bf16.msrb.mxu2 %v3797_v50  ;;  %v3733_v49 = vor.u32 %v4501_v41, %v3732_v39  ;;  %v3460_v50 = vld [vmem:[#allocation9 + $0x428] sm:$0xf]  ;;  %v4529_v59 = vld [vmem:[#allocation9 + $0x734] sm:$0xf0]  ;;  %v1726_v2 = vpop.f32.mrf.mxu0  ;;  %v4387_v43 = vld [vmem:[#allocation9 + $0x2cc] sm:$0xf] }
  0xc8   :  { %2015 = vmatpush.bf16.msrb.mxu3 %v3925_v54  ;;  %v4465_v54 = vld [vmem:[#allocation9 + $0x534] sm:$0xf0]  ;;  %v3461_v61 = vor.u32 %v4433_v51, %v3460_v50  ;;  %v3700_v8 = vld [vmem:[#allocation9 + $0x608] sm:$0xf]  ;;  %v3845_v10 = vor.u32 %v4529_v59, %v3844_v58  ;;  %v4319_v50 = vld [vmem:[#allocation9 + $0xac] sm:$0xf] }
  0xc9   :  { %1977 = vmatpush.bf16.msrb.mxu0 %v3525_v60  ;;  %v3589_v3 = vor.u32 %v4465_v54, %v3588_v52  ;;  %v4461_v6 = vld [vmem:[#allocation9 + $0x514] sm:$0xf0]  ;;  %v3828_v12 = vld [vmem:[#allocation9 + $0x708] sm:$0xf]  ;;  %v3014_v51 = vld [vmem:[#allocation9 + $0xb8] sm:$0xf0] }
  0xca   :  { %v3573_v25 = vor.u32 %v4461_v6, %v3572_v5  ;;  %v4351_v52 = vld [vmem:[#allocation9 + $0x1ac] sm:$0xf]  ;;  %v3142_v54 = vld [vmem:[#allocation9 + $0x1b8] sm:$0xf0]  ;;  %v3017_v59 = vor.u32 %v4319_v50, %v3014_v51 }
  0xcb   :  { %1990 = vmatpush.bf16.msrb.mxu1 %v3653_v62  ;;  %2003 = vmatpush.bf16.msrb.mxu2 %v3781_v0  ;;  %v1737_v44 = vpop.f32.mrf.mxu1  ;;  %v3444_v62 = vld [vmem:[#allocation9 + $0x408] sm:$0xf]  ;;  %v4429_v0 = vld [vmem:[#allocation9 + $0x414] sm:$0xf0]  ;;  %v3398_v58 = vld [vmem:[#allocation9 + $0x3b8] sm:$0xf0] }
  0xcc   :  { %2016 = vmatpush.bf16.msrb.mxu3 %v3909_v4  ;;  %v1738_v47 = vadd.f32 %v1737_v44, %v1725_v33  ;;  %v3717_v4 = vor.u32 %v4497_v56, %v3716_v55  ;;  %v3445_v21 = vor.u32 %v4429_v0, %v3444_v62  ;;  %v4323_v33 = vld [vmem:[#allocation9 + $0xcc] sm:$0xf]  ;;  %v3286_v44 = vld [vmem:[#allocation9 + $0x2d8] sm:$0xf0] }
  0xcd   :  { %1978 = vmatpush.bf16.msrb.mxu0 %v3509_v11  ;;  %v4493_v11 = vld [vmem:[#allocation9 + $0x614] sm:$0xf0]  ;;  %v4383_v55 = vld [vmem:[#allocation9 + $0x2ac] sm:$0xf]  ;;  %v3270_v56 = vld [vmem:[#allocation9 + $0x2b8] sm:$0xf0] }
  0xce   :  { %v1751_v57 = vadd.f32 %v1750_v45, %v1738_v47  ;;  %v4419_v45 = vld [vmem:[#allocation9 + $0x3cc] sm:$0xf]  ;;  %v2998_v0 = vld [vmem:[#allocation9 + $0x98] sm:$0xf0] }
  0xcf   :  { %1991 = vmatpush.bf16.msrb.mxu1 %v3637_v13  ;;  %2004 = vmatpush.bf16.msrb.mxu2 %v3765_v14  ;;  %v4525_v13 = vld [vmem:[#allocation9 + $0x714] sm:$0xf0]  ;;  %v4327_v14 = vld [vmem:[#allocation9 + $0xec] sm:$0xf]  ;;  %v3254_v6 = vld [vmem:[#allocation9 + $0x298] sm:$0xf0] }
  0xd0   :  { %2017 = vmatpush.bf16.msrb.mxu3 %v3893_v20  ;;  %v1763_v60 = vpop.f32.mrf.mxu3  ;;  %v1752_v20 = vpop.f32.mrf.mxu2  ;;  %v3049_v30 = vor.u32 %v4327_v14, %v3046_v15  ;;  %v4315_v62 = vld [vmem:[#allocation9 + $0x8c] sm:$0xf]  ;;  %v3110_v23 = vld [vmem:[#allocation9 + $0x178] sm:$0xf0] }
  0xd1   :  { %1979 = vmatpush.bf16.msrb.mxu0 %v3493_v26  ;;  %v4979_v1 = vadd.f32 %v1763_v60, %v1751_v57  ;;  %v3701_v26 = vor.u32 %v4493_v11, %v3700_v8  ;;  %v4415_v57 = vld [vmem:[#allocation9 + $0x3ac] sm:$0xf]  ;;  %v3145_v60 = vor.u32 %v4351_v52, %v3142_v54  ;;  %v3001_v11 = vor.u32 %v4315_v62, %v2998_v0 }
  0xd2   :  { %v4347_v2 = vld [vmem:[#allocation9 + $0x18c] sm:$0xf] }
  0xd3   :  { %1992 = vmatpush.bf16.msrb.mxu1 %v3621_v28  ;;  %2005 = vmatpush.bf16.msrb.mxu2 %v3749_v29  ;;  %v1739_v19 = vpop.f32.mrf.mxu1  ;;  %v3430_v28 = vld [vmem:[#allocation9 + $0x3f8] sm:$0xf0]  ;;  %v3829_v29 = vor.u32 %v4525_v13, %v3828_v12  ;;  %v4379_v5 = vld [vmem:[#allocation9 + $0x28c] sm:$0xf] }
  0xd4   :  { %2018 = vmatpush.bf16.msrb.mxu3 %v3877_v35  ;;  %v3030_v35 = vld [vmem:[#allocation9 + $0xd8] sm:$0xf0]  ;;  %v3433_v41 = vor.u32 %v4423_v27, %v3430_v28  ;;  %v4411_v8 = vld [vmem:[#allocation9 + $0x38c] sm:$0xf]  ;;  %v3257_v14 = vor.u32 %v4379_v5, %v3254_v6 }
  0xd5   :  { %1980 = vmatpush.bf16.msrb.mxu0 %v3477_v46  ;;  %v3414_v46 = vld [vmem:[#allocation9 + $0x3d8] sm:$0xf0]  ;;  %v3033_v47 = vor.u32 %v4323_v33, %v3030_v35  ;;  %v4311_v15 = vld [vmem:[#allocation9 + $0x6c] sm:$0xf] }
  0xd6   :  { %v4343_v19 = vld [vmem:[#allocation9 + $0x16c] sm:$0xf]  ;;  %v3366_v27 = vld [vmem:[#allocation9 + $0x378] sm:$0xf0] }
  0xd7   :  { %1993 = vmatpush.bf16.msrb.mxu1 %v3605_v48  ;;  %2006 = vmatpush.bf16.msrb.mxu2 %v3733_v49  ;;  %v3161_v48 = vor.u32 %v4355_v36, %v3158_v42  ;;  %v3289_v49 = vor.u32 %v4387_v43, %v3286_v44  ;;  %v4375_v24 = vld [vmem:[#allocation9 + $0x26c] sm:$0xf]  ;;  %v2966_v33 = vld [vmem:[#allocation9 + $0x58] sm:$0xf0] }
  0xd8   :  { %2019 = vmatpush.bf16.msrb.mxu3 %v3861_v53  ;;  %v1765_v39 = vpop.f32.mrf.mxu3  ;;  %v3417_v53 = vor.u32 %v4419_v45, %v3414_v46  ;;  %v4339_v35 = vld [vmem:[#allocation9 + $0x14c] sm:$0xf]  ;;  %v3222_v42 = vld [vmem:[#allocation9 + $0x258] sm:$0xf0] }
  0xd9   :  { %1981 = vmatpush.bf16.msrb.mxu0 %v3461_v61  ;;  %v3273_v61 = vor.u32 %v4383_v55, %v3270_v56  ;;  %v3094_v39 = vld [vmem:[#allocation9 + $0x158] sm:$0xf0]  ;;  %v4403_v45 = vld [vmem:[#allocation9 + $0x34c] sm:$0xf] }
  0xda   :  { %v3350_v46 = vld [vmem:[#allocation9 + $0x358] sm:$0xf0]  ;;  %v3097_v50 = vor.u32 %v4339_v35, %v3094_v39  ;;  %v4303_v52 = vld [vmem:[#allocation9 + $0x2c] sm:$0xf] }
  0xdb   :  { %1994 = vmatpush.bf16.msrb.mxu1 %v3589_v3  ;;  %2007 = vmatpush.bf16.msrb.mxu2 %v3717_v4  ;;  %v3401_v3 = vor.u32 %v4415_v57, %v3398_v58  ;;  %v3126_v4 = vld [vmem:[#allocation9 + $0x198] sm:$0xf0]  ;;  %v4335_v54 = vld [vmem:[#allocation9 + $0x12c] sm:$0xf]  ;;  %v3353_v56 = vor.u32 %v4403_v45, %v3350_v46 }
  0xdc   :  { %2020 = vmatpush.bf16.msrb.mxu3 %v3845_v10  ;;  %v3382_v10 = vld [vmem:[#allocation9 + $0x398] sm:$0xf0]  ;;  %v3129_v13 = vor.u32 %v4347_v2, %v3126_v4  ;;  %v4367_v58 = vld [vmem:[#allocation9 + $0x22c] sm:$0xf] }
  0xdd   :  { %1982 = vmatpush.bf16.msrb.mxu0 %v3445_v21  ;;  %v1776_v12 = vpop.f32.mrf.mxu0  ;;  %v3385_v22 = vor.u32 %v4411_v8, %v3382_v10  ;;  %v3078_v57 = vld [vmem:[#allocation9 + $0x138] sm:$0xf0]  ;;  %v4299_v0 = vld [vmem:[#allocation9 + $0xc] sm:$0xf] }
  0xde   :  { %v1777_v20 = vadd.f32 %v1776_v12, %v4979_v1  ;;  %v2934_v2 = vld [vmem:[#allocation9 + $0x18] sm:$0xf0]  ;;  %v4331_v5 = vld [vmem:[#allocation9 + $0x10c] sm:$0xf] }
  0xdf   :  { %1995 = vmatpush.bf16.msrb.mxu1 %v3573_v25  ;;  %2008 = vmatpush.bf16.msrb.mxu2 %v3701_v26  ;;  %v1789_v21 = vpop.f32.mrf.mxu1  ;;  %v3238_v25 = vld [vmem:[#allocation9 + $0x278] sm:$0xf0]  ;;  %v4407_v26 = vld [vmem:[#allocation9 + $0x36c] sm:$0xf] }
  0xe0   :  { %2021 = vmatpush.bf16.msrb.mxu3 %v3829_v29  ;;  %1983 = vmatmul.bf16.vlgmr.msrb.gmra.mxu0 %v4951_v37  ;;  %v1790_v28 = vadd.f32 %v1789_v21, %v1777_v20  ;;  %v2985_v29 = vor.u32 %v4311_v15, %v2982_v18  ;;  %v3369_v1 = vor.u32 %v4407_v26, %v3366_v27  ;;  %v3062_v6 = vld [vmem:[#allocation9 + $0x118] sm:$0xf0]  ;;  %v4363_v8 = vld [vmem:[#allocation9 + $0x20c] sm:$0xf] }
  0xe1   :  { %2027 = vmatpush.bf16.msra.mxu0 %v3049_v30  ;;  %v3113_v30 = vor.u32 %v4343_v19, %v3110_v23  ;;  %v3190_v12 = vld [vmem:[#allocation9 + $0x218] sm:$0xf0]  ;;  %v4455_v18 = vld [vmem:[#allocation9 + $0x4ec] sm:$0xf]  ;;  %v2937_v21 = vor.u32 %v4299_v0, %v2934_v2 }
  0xe2   :  { %2009 = vmatmul.bf16.vlgmr.msrb.gmra.mxu2 %v4949_v34  ;;  %1996 = vmatmul.bf16.vlgmr.msrb.gmra.mxu1 %v4955_v40  ;;  %v3558_v19 = vld [vmem:[#allocation9 + $0x4f8] sm:$0xf0]  ;;  %v4487_v20 = vld [vmem:[#allocation9 + $0x5ec] sm:$0xf]  ;;  %v3193_v26 = vor.u32 %v4363_v8, %v3190_v12 }
  0xe3   :  { %2040 = vmatpush.bf16.msra.mxu1 %v3177_v31  ;;  %2053 = vmatpush.bf16.msra.mxu2 %v3305_v32  ;;  %v3241_v31 = vor.u32 %v4375_v24, %v3238_v25  ;;  %v4307_v32 = vld [vmem:[#allocation9 + $0x4c] sm:$0xf]  ;;  %v3814_v24 = vld [vmem:[#allocation9 + $0x6f8] sm:$0xf0]  ;;  %v3065_v25 = vor.u32 %v4331_v5, %v3062_v6 }
  0xe4   :  { %2066 = vmatpush.bf16.msra.mxu3 %v3433_v41  ;;  %v4371_v41 = vld [vmem:[#allocation9 + $0x24c] sm:$0xf]  ;;  %v3542_v35 = vld [vmem:[#allocation9 + $0x4d8] sm:$0xf0] }
  0xe5   :  { %2022 = vmatmul.bf16.vlgmr.msrb.gmra.mxu3 %v4953_v38  ;;  %2028 = vmatpush.bf16.msra.mxu0 %v3033_v47  ;;  %v1802_v36 = vpop.f32.mrf.mxu2  ;;  %v2969_v47 = vor.u32 %v4307_v32, %v2966_v33  ;;  %v3225_v51 = vor.u32 %v4371_v41, %v3222_v42  ;;  %v4519_v23 = vld [vmem:[#allocation9 + $0x6ec] sm:$0xf]  ;;  %v3670_v39 = vld [vmem:[#allocation9 + $0x5d8] sm:$0xf0] }
  0xe6   :  { %v1803_v43 = vadd.f32 %v1802_v36, %v1790_v28  ;;  %v4551_v27 = vld [vmem:[#allocation9 + $0x7ec] sm:$0xf]  ;;  %v3942_v28 = vld [vmem:[#allocation9 + $0x7f8] sm:$0xf0]  ;;  %v3817_v32 = vor.u32 %v4519_v23, %v3814_v24 }
  0xe7   :  { %2041 = vmatpush.bf16.msra.mxu1 %v3161_v48  ;;  %2054 = vmatpush.bf16.msra.mxu2 %v3289_v49  ;;  %v1778_v49 = vpop.f32.mrf.mxu0  ;;  %v1791_v55 = vpop.f32.mrf.mxu1  ;;  %v4451_v33 = vld [vmem:[#allocation9 + $0x4cc] sm:$0xf]  ;;  %v3798_v42 = vld [vmem:[#allocation9 + $0x6d8] sm:$0xf0] }
  0xe8   :  { %2067 = vmatpush.bf16.msra.mxu3 %v3417_v53  ;;  %v1815_v44 = vpop.f32.mrf.mxu3  ;;  %v2950_v53 = vld [vmem:[#allocation9 + $0x38] sm:$0xf0]  ;;  %v4483_v36 = vld [vmem:[#allocation9 + $0x5cc] sm:$0xf]  ;;  %v3545_v45 = vor.u32 %v4451_v33, %v3542_v35 }
  0xe9   :  { %2029 = vmatpush.bf16.msra.mxu0 %v3017_v59  ;;  %v4986_v48 = vadd.f32 %v1815_v44, %v1803_v43  ;;  %v3206_v59 = vld [vmem:[#allocation9 + $0x238] sm:$0xf0]  ;;  %v2953_v62 = vor.u32 %v4303_v52, %v2950_v53  ;;  %v4515_v41 = vld [vmem:[#allocation9 + $0x6cc] sm:$0xf]  ;;  %v3673_v46 = vor.u32 %v4483_v36, %v3670_v39 }
  0xea   :  { %v3209_v4 = vor.u32 %v4367_v58, %v3206_v59  ;;  %v4547_v43 = vld [vmem:[#allocation9 + $0x7cc] sm:$0xf]  ;;  %v3926_v44 = vld [vmem:[#allocation9 + $0x7d8] sm:$0xf0] }
  0xeb   :  { %2042 = vmatpush.bf16.msra.mxu1 %v3145_v60  ;;  %2055 = vmatpush.bf16.msra.mxu2 %v3273_v61  ;;  %v4399_v60 = vld [vmem:[#allocation9 + $0x32c] sm:$0xf]  ;;  %v3334_v61 = vld [vmem:[#allocation9 + $0x338] sm:$0xf0]  ;;  %v3929_v52 = vor.u32 %v4547_v43, %v3926_v44  ;;  %vm2131_vm1 = vcmp.gt.f32.partialorder %v4986_v48, 0.0 }
  0xec   :  { %2068 = vmatpush.bf16.msra.mxu3 %v3401_v3  ;;  %v3081_v3 = vor.u32 %v4335_v54, %v3078_v57  ;;  %v4447_v49 = vld [vmem:[#allocation9 + $0x4ac] sm:$0xf]  ;;  %v3654_v53 = vld [vmem:[#allocation9 + $0x5b8] sm:$0xf0] }
  0xed   :  { %2030 = vmatpush.bf16.msra.mxu0 %v3001_v11  ;;  %v1804_v10 = vpop.f32.mrf.mxu2  ;;  %v3337_v11 = vor.u32 %v4399_v60, %v3334_v61  ;;  %v4511_v54 = vld [vmem:[#allocation9 + $0x6ac] sm:$0xf]  ;;  %v3782_v55 = vld [vmem:[#allocation9 + $0x6b8] sm:$0xf0] }
  0xee   :  { %v3910_v57 = vld [vmem:[#allocation9 + $0x7b8] sm:$0xf0]  ;;  %v3785_v60 = vor.u32 %v4511_v54, %v3782_v55  ;;  %v4443_v61 = vld [vmem:[#allocation9 + $0x48c] sm:$0xf]  ;;  %v428_v54 = vperm.slane %v4976_v7, 1 }
  0xef   :  { %2043 = vmatpush.bf16.msra.mxu1 %v3129_v13  ;;  %2056 = vmatpush.bf16.msra.mxu2 %v3257_v14  ;;  %v4395_v13 = vld [vmem:[#allocation9 + $0x30c] sm:$0xf]  ;;  %v3318_v14 = vld [vmem:[#allocation9 + $0x318] sm:$0xf0]  ;;  %v4569_v7 = vld [vmem:[#allocation10 + $0x74] sm:$0xf0] }
  0xf0   :  { %2069 = vmatpush.bf16.msra.mxu3 %v3385_v22  ;;  %v1817_v15 = vpop.f32.mrf.mxu3  ;;  %v3686_v22 = vld [vmem:[#allocation9 + $0x5f8] sm:$0xf0]  ;;  %v4539_v5 = vld [vmem:[#allocation9 + $0x78c] sm:$0xf] }
  0xf1   :  { %2031 = vmatpush.bf16.msra.mxu0 %v2985_v29  ;;  %v3321_v29 = vor.u32 %v4395_v13, %v3318_v14  ;;  %v3638_v2 = vld [vmem:[#allocation9 + $0x598] sm:$0xf0]  ;;  %v4439_v10 = vld [vmem:[#allocation9 + $0x46c] sm:$0xf] }
  0xf2   :  { %v4471_v12 = vld [vmem:[#allocation9 + $0x56c] sm:$0xf]  ;;  %v3622_v15 = vld [vmem:[#allocation9 + $0x578] sm:$0xf0] }
  0xf3   :  { %2044 = vmatpush.bf16.msra.mxu1 %v3113_v30  ;;  %2057 = vmatpush.bf16.msra.mxu2 %v3241_v31  ;;  %v3561_v30 = vor.u32 %v4455_v18, %v3558_v19  ;;  %v3689_v31 = vor.u32 %v4487_v20, %v3686_v22  ;;  %v4503_v18 = vld [vmem:[#allocation9 + $0x66c] sm:$0xf]  ;;  %v3750_v19 = vld [vmem:[#allocation9 + $0x678] sm:$0xf0]  ;;  %v3625_v23 = vor.u32 %v4471_v12, %v3622_v15 }
  0xf4   :  { %2070 = vmatpush.bf16.msra.mxu3 %v3369_v1  ;;  %v3945_v1 = vor.u32 %v4551_v27, %v3942_v28  ;;  %v4535_v20 = vld [vmem:[#allocation9 + $0x76c] sm:$0xf]  ;;  %v3753_v24 = vor.u32 %v4503_v18, %v3750_v19  ;;  %v3862_v36 = vld [vmem:[#allocation9 + $0x758] sm:$0xf0] }
  0xf5   :  { %2032 = vmatpush.bf16.msra.mxu0 %v2969_v47  ;;  %v3801_v47 = vor.u32 %v4515_v41, %v3798_v42  ;;  %v4467_v27 = vld [vmem:[#allocation9 + $0x54c] sm:$0xf]  ;;  %v3462_v44 = vld [vmem:[#allocation9 + $0x438] sm:$0xf0] }
  0xf6   :  { %v4531_v35 = vld [vmem:[#allocation9 + $0x74c] sm:$0xf] }
  0xf7   :  { %2045 = vmatpush.bf16.msra.mxu1 %v3097_v50  ;;  %2058 = vmatpush.bf16.msra.mxu2 %v3225_v51  ;;  %v3526_v50 = vld [vmem:[#allocation9 + $0x4b8] sm:$0xf0]  ;;  %v4479_v51 = vld [vmem:[#allocation9 + $0x5ac] sm:$0xf] }
  0xf8   :  { %2071 = vmatpush.bf16.msra.mxu3 %v3353_v56  ;;  %v4543_v56 = vld [vmem:[#allocation9 + $0x7ac] sm:$0xf]  ;;  %v3529_v58 = vor.u32 %v4447_v49, %v3526_v50  ;;  %v3657_v59 = vor.u32 %v4479_v51, %v3654_v53  ;;  %v3590_v49 = vld [vmem:[#allocation9 + $0x538] sm:$0xf0] }
  0xf9   :  { %2033 = vmatpush.bf16.msra.mxu0 %v2953_v62  ;;  %v3510_v62 = vld [vmem:[#allocation9 + $0x498] sm:$0xf0]  ;;  %v3913_v0 = vor.u32 %v4543_v56, %v3910_v57  ;;  %v4431_v43 = vld [vmem:[#allocation9 + $0x42c] sm:$0xf] }
  0xfa   :  { %v4495_v50 = vld [vmem:[#allocation9 + $0x62c] sm:$0xf]  ;;  %v3718_v51 = vld [vmem:[#allocation9 + $0x638] sm:$0xf0]  ;;  %v3465_v55 = vor.u32 %v4431_v43, %v3462_v44  ;;  %v3972_v43 = vld [vmem:[#allocation10 + $0x30] sm:$0xf] }
  0xfb   :  { %2046 = vmatpush.bf16.msra.mxu1 %v3081_v3  ;;  %2059 = vmatpush.bf16.msra.mxu2 %v3209_v4  ;;  %v4507_v3 = vld [vmem:[#allocation9 + $0x68c] sm:$0xf]  ;;  %v3766_v4 = vld [vmem:[#allocation9 + $0x698] sm:$0xf0]  ;;  %v4036_v44 = vld [vmem:[#allocation10 + $0xb0] sm:$0xf] }
  0xfc   :  { %2072 = vmatpush.bf16.msra.mxu3 %v3337_v11  ;;  %v3769_v8 = vor.u32 %v4507_v3, %v3766_v4  ;;  %v3494_v11 = vld [vmem:[#allocation9 + $0x478] sm:$0xf0]  ;;  %v4427_v56 = vld [vmem:[#allocation9 + $0x40c] sm:$0xf] }
  0xfd   :  { %2034 = vmatpush.bf16.msra.mxu0 %v2937_v21  ;;  %v4992_v6 = vpop.f32.mrf.mxu0  ;;  %v3878_v21 = vld [vmem:[#allocation9 + $0x778] sm:$0xf0]  ;;  %v3497_v22 = vor.u32 %v4439_v10, %v3494_v11  ;;  %v4523_v3 = vld [vmem:[#allocation9 + $0x70c] sm:$0xf]  ;;  %v4585_v10 = vld [vmem:[#allocation10 + $0xf4] sm:$0xf0] }
  0xfe   :  { %v3846_v53 = vld [vmem:[#allocation9 + $0x738] sm:$0xf0] }
  0xff   :  { %2047 = vmatpush.bf16.msra.mxu1 %v3065_v25  ;;  %2060 = vmatpush.bf16.msra.mxu2 %v3193_v26  ;;  %v4994_v13 = vpop.f32.mrf.mxu1  ;;  %v4435_v25 = vld [vmem:[#allocation9 + $0x44c] sm:$0xf]  ;;  %v3478_v26 = vld [vmem:[#allocation9 + $0x458] sm:$0xf0] }
 0x100   :  { %2073 = vmatpush.bf16.msra.mxu3 %v3321_v29  ;;  %2035 = vmatmul.bf16.vlgmr.msra.gmra.mxu0 %v4940_v9  ;;  %v3894_v9 = vld [vmem:[#allocation9 + $0x798] sm:$0xf0]  ;;  %v3881_v29 = vor.u32 %v4535_v20, %v3878_v21  ;;  %v3996_v20 = vld [vmem:[#allocation10 + $0x60] sm:$0xf]  ;;  %v4567_v21 = vld [vmem:[#allocation10 + $0x64] sm:$0xf0] }
 0x101   :  { %2079 = vmatpush.bf16.msrb.mxu0 %v3561_v30  ;;  %v3897_v14 = vor.u32 %v4539_v5, %v3894_v9  ;;  %v3606_v30 = vld [vmem:[#allocation9 + $0x558] sm:$0xf0]  ;;  %v4004_v9 = vld [vmem:[#allocation10 + $0x70] sm:$0xf] }
 0x102   :  { %2061 = vmatmul.bf16.vlgmr.msra.gmra.mxu2 %v4937_v63  ;;  %2048 = vmatmul.bf16.vlgmr.msra.gmra.mxu1 %v4944_v17  ;;  %v4475_v63 = vld [vmem:[#allocation9 + $0x58c] sm:$0xf]  ;;  %v3609_v41 = vor.u32 %v4467_v27, %v3606_v30  ;;  %v3830_v5 = vld [vmem:[#allocation9 + $0x718] sm:$0xf0]  ;;  %v4005_v15 = vor.u32 %v4569_v7, %v4004_v9  ;;  %v4565_v27 = vld [vmem:[#allocation10 + $0x54] sm:$0xf0] }
 0x103   :  { %2092 = vmatpush.bf16.msrb.mxu1 %v3689_v31  ;;  %2105 = vmatpush.bf16.msrb.mxu2 %v3817_v32  ;;  %v3641_v17 = vor.u32 %v4475_v63, %v3638_v2  ;;  %v4499_v31 = vld [vmem:[#allocation9 + $0x64c] sm:$0xf]  ;;  %v3734_v32 = vld [vmem:[#allocation9 + $0x658] sm:$0xf0]  ;;  %v4557_v9 = vld [vmem:[#allocation10 + $0x14] sm:$0xf0] }
 0x104   :  { %2118 = vmatpush.bf16.msrb.mxu3 %v3945_v1  ;;  %v3481_v1 = vor.u32 %v4435_v25, %v3478_v26  ;;  %v3737_v42 = vor.u32 %v4499_v31, %v3734_v32  ;;  %v3702_v2 = vld [vmem:[#allocation9 + $0x618] sm:$0xf0]  ;;  %v3988_v26 = vld [vmem:[#allocation10 + $0x50] sm:$0xf] }
 0x105   :  { %2074 = vmatmul.bf16.vlgmr.msra.gmra.mxu3 %v4942_v16  ;;  %2080 = vmatpush.bf16.msrb.mxu0 %v3545_v45  ;;  %v3513_v16 = vor.u32 %v4443_v61, %v3510_v62  ;;  %v4996_v28 = vpop.f32.mrf.mxu2  ;;  %v1830_v39 = vpop.f32.mrf.mxu0  ;;  %v4463_v45 = vld [vmem:[#allocation9 + $0x52c] sm:$0xf]  ;;  %v3574_v61 = vld [vmem:[#allocation9 + $0x518] sm:$0xf0]  ;;  %v3989_v30 = vor.u32 %v4565_v27, %v3988_v26  ;;  %v4100_v26 = vld [vmem:[#allocation10 + $0x130] sm:$0xf] }
 0x106   :  { %v3593_v57 = vor.u32 %v4463_v45, %v3590_v49  ;;  %v4601_v39 = vld [vmem:[#allocation10 + $0x174] sm:$0xf0]  ;;  %v4599_v49 = vld [vmem:[#allocation10 + $0x164] sm:$0xf0] }
 0x107   :  { %2093 = vmatpush.bf16.msrb.mxu1 %v3673_v46  ;;  %2106 = vmatpush.bf16.msrb.mxu2 %v3801_v47  ;;  %v1843_v46 = vpop.f32.mrf.mxu1  ;;  %v3865_v47 = vor.u32 %v4531_v35, %v3862_v36  ;;  %v4563_v35 = vld [vmem:[#allocation10 + $0x44] sm:$0xf0]  ;;  %v4044_v36 = vld [vmem:[#allocation10 + $0xc0] sm:$0xf]  ;;  %v4593_v27 = vld [vmem:[#allocation10 + $0x134] sm:$0xf0] }
 0x108   :  { %2119 = vmatpush.bf16.msrb.mxu3 %v3929_v52  ;;  %v4998_v33 = vpop.f32.mrf.mxu3  ;;  %v4527_v52 = vld [vmem:[#allocation9 + $0x72c] sm:$0xf] }
 0x109   :  { %2081 = vmatpush.bf16.msrb.mxu0 %v3529_v58  ;;  %v3721_v58 = vor.u32 %v4495_v50, %v3718_v51  ;;  %v3849_v63 = vor.u32 %v4527_v52, %v3846_v53 }
 0x10b   :  { %2094 = vmatpush.bf16.msrb.mxu1 %v3657_v59  ;;  %2107 = vmatpush.bf16.msrb.mxu2 %v3785_v60  ;;  %v3446_v59 = vld [vmem:[#allocation9 + $0x418] sm:$0xf0]  ;;  %v4459_v60 = vld [vmem:[#allocation9 + $0x50c] sm:$0xf] }
 0x10c   :  { %2120 = vmatpush.bf16.msrb.mxu3 %v3913_v0  ;;  %v4491_v0 = vld [vmem:[#allocation9 + $0x60c] sm:$0xf]  ;;  %v3577_v11 = vor.u32 %v4459_v60, %v3574_v61  ;;  %v4116_v61 = vld [vmem:[#allocation10 + $0x150] sm:$0xf] }
 0x10d   :  { %2082 = vmatpush.bf16.msrb.mxu0 %v3513_v16  ;;  %v1856_v62 = vpop.f32.mrf.mxu2  ;;  %v1829_v16 = vadd.f32 %v4992_v6, %v428_v54  ;;  %v3705_v12 = vor.u32 %v4491_v0, %v3702_v2  ;;  %v3997_v6 = vor.u32 %v4567_v21, %v3996_v20  ;;  %v3964_v54 = vld [vmem:[#allocation10 + $0x20] sm:$0xf] }
 0x10e   :  { %v4597_v62 = vld [vmem:[#allocation10 + $0x154] sm:$0xf0] }
 0x10f   :  { %2095 = vmatpush.bf16.msrb.mxu1 %v3641_v17  ;;  %2108 = vmatpush.bf16.msrb.mxu2 %v3769_v8  ;;  %v3449_v17 = vor.u32 %v4427_v56, %v3446_v59  ;;  %v4068_v8 = vld [vmem:[#allocation10 + $0xf0] sm:$0xf]  ;;  %v1842_v19 = vadd.f32 %v4994_v13, %v1829_v16  ;;  %v4028_v56 = vld [vmem:[#allocation10 + $0xa0] sm:$0xf] }
 0x110   :  { %2121 = vmatpush.bf16.msrb.mxu3 %v3897_v14  ;;  %v1869_v4 = vpop.f32.mrf.mxu3  ;;  %v3833_v14 = vor.u32 %v4523_v3, %v3830_v5  ;;  %v4069_v18 = vor.u32 %v4585_v10, %v4068_v8  ;;  %v4052_v13 = vld [vmem:[#allocation10 + $0xd0] sm:$0xf]  ;;  %v4108_v8 = vld [vmem:[#allocation10 + $0x140] sm:$0xf]  ;;  %v2135_v10 = vmul.f32 0.01, %v4986_v48 }
 0x111   :  { %2083 = vmatpush.bf16.msrb.mxu0 %v3497_v22  ;;  %v4060_v22 = vld [vmem:[#allocation10 + $0xe0] sm:$0xf]  ;;  %v1855_v25 = vadd.f32 %v4996_v28, %v1842_v19  ;;  %v4579_v28 = vld [vmem:[#allocation10 + $0xc4] sm:$0xf0]  ;;  %v3956_v5 = vld [vmem:[#allocation10 + $0x10] sm:$0xf] }
 0x112   :  { %v4020_v16 = vld [vmem:[#allocation10 + $0x90] sm:$0xf]  ;;  %v4571_v19 = vld [vmem:[#allocation10 + $0x84] sm:$0xf0] }
 0x113   :  { %2096 = vmatpush.bf16.msrb.mxu1 %v3625_v23  ;;  %2109 = vmatpush.bf16.msrb.mxu2 %v3753_v24  ;;  %v4583_v23 = vld [vmem:[#allocation10 + $0xe4] sm:$0xf0]  ;;  %v1868_v31 = vadd.f32 %v4998_v33, %v1855_v25  ;;  %v4577_v33 = vld [vmem:[#allocation10 + $0xb4] sm:$0xf0] }
 0x114   :  { %2122 = vmatpush.bf16.msrb.mxu3 %v3881_v29  ;;  %v4061_v24 = vor.u32 %v4583_v23, %v4060_v22  ;;  %v4581_v29 = vld [vmem:[#allocation10 + $0xd4] sm:$0xf0]  ;;  %v4037_v53 = vor.u32 %v4577_v33, %v4036_v44  ;;  %v4568_v23 = vld [vmem:[#allocation10 + $0x74] sm:$0xf] }
 0x115   :  { %2084 = vmatpush.bf16.msrb.mxu0 %v3481_v1  ;;  %v4053_v32 = vor.u32 %v4581_v29, %v4052_v13  ;;  %v4132_v1 = vld [vmem:[#allocation10 + $0x170] sm:$0xf]  ;;  %v4584_v13 = vld [vmem:[#allocation10 + $0xf4] sm:$0xf]  ;;  %v4070_v29 = vld [vmem:[#allocation10 + $0xf8] sm:$0xf0] }
 0x116   :  { %v4589_v33 = vld [vmem:[#allocation10 + $0x114] sm:$0xf0] }
 0x117   :  { %2097 = vmatpush.bf16.msrb.mxu1 %v3609_v41  ;;  %2110 = vmatpush.bf16.msrb.mxu2 %v3737_v42  ;;  %v4133_v41 = vor.u32 %v4601_v39, %v4132_v1  ;;  %v4045_v42 = vor.u32 %v4579_v28, %v4044_v36  ;;  %v2139_v36 = vsel %vm2131_vm1, %v4986_v48, %v2135_v10  ;;  %v4566_v1 = vld [vmem:[#allocation10 + $0x64] sm:$0xf]  ;;  %v3998_v39 = vld [vmem:[#allocation10 + $0x68] sm:$0xf0] }
 0x118   :  { %2123 = vmatpush.bf16.msrb.mxu3 %v3865_v47  ;;  %v4124_v47 = vld [vmem:[#allocation10 + $0x160] sm:$0xf]  ;;  %v4073_v28 = vor.u32 %v4584_v13, %v4070_v29  ;;  %v5014_v44 = vpack.c.bf16 %v2139_v36, %v2139_v36  ;;  %v4126_v10 = vld [vmem:[#allocation10 + $0x168] sm:$0xf0]  ;;  %v3958_v13 = vld [vmem:[#allocation10 + $0x18] sm:$0xf0] }
 0x119   :  { %2085 = vmatpush.bf16.msrb.mxu0 %v3465_v55  ;;  %v4125_v51 = vor.u32 %v4599_v49, %v4124_v47  ;;  %v4559_v55 = vld [vmem:[#allocation10 + $0x24] sm:$0xf0]  ;;  %v4564_v47 = vld [vmem:[#allocation10 + $0x54] sm:$0xf]  ;;  %v3990_v49 = vld [vmem:[#allocation10 + $0x58] sm:$0xf0] }
 0x11a   :  { %v3965_v0 = vor.u32 %v4559_v55, %v3964_v54  ;;  %v4587_v54 = vld [vmem:[#allocation10 + $0x104] sm:$0xf0]  ;;  %v4600_v55 = vld [vmem:[#allocation10 + $0x174] sm:$0xf] }
 0x11b   :  { %2098 = vmatpush.bf16.msrb.mxu1 %v3593_v57  ;;  %2111 = vmatpush.bf16.msrb.mxu2 %v3721_v58  ;;  %v4575_v58 = vld [vmem:[#allocation10 + $0xa4] sm:$0xf0] }
 0x11c   :  { %2124 = vmatpush.bf16.msrb.mxu3 %v3849_v63  ;;  %v4117_v63 = vor.u32 %v4597_v62, %v4116_v61  ;;  %v4029_v3 = vor.u32 %v4575_v58, %v4028_v56  ;;  %v4134_v56 = vld [vmem:[#allocation10 + $0x178] sm:$0xf0]  ;;  %v4578_v62 = vld [vmem:[#allocation10 + $0xc4] sm:$0xf] }
 0x11d   :  { %2086 = vmatpush.bf16.msrb.mxu0 %v3449_v17  ;;  %v4573_v17 = vld [vmem:[#allocation10 + $0x94] sm:$0xf0] }
 0x11e   :  { %v4021_v22 = vor.u32 %v4573_v17, %v4020_v16  ;;  %v4038_v16 = vld [vmem:[#allocation10 + $0xb8] sm:$0xf0] }
 0x11f   :  { %2099 = vmatpush.bf16.msrb.mxu1 %v3577_v11  ;;  %2112 = vmatpush.bf16.msrb.mxu2 %v3705_v12  ;;  %v1893_v46 = vpop.f32.mrf.mxu1  ;;  %v3948_v11 = vld [vmem:[#allocation10] sm:$0xf]  ;;  %v4595_v12 = vld [vmem:[#allocation10 + $0x144] sm:$0xf0] }
 0x120   :  { %2125 = vmatpush.bf16.msrb.mxu3 %v3833_v14  ;;  %2087 = vmatmul.bf16.vlgmr.msrb.gmra.mxu0 %v4951_v37  ;;  %v3980_v37 = vld [vmem:[#allocation10 + $0x40] sm:$0xf]  ;;  %v3957_v14 = vor.u32 %v4557_v9, %v3956_v5  ;;  %v4109_v20 = vor.u32 %v4595_v12, %v4108_v8  ;;  %v3974_v5 = vld [vmem:[#allocation10 + $0x38] sm:$0xf0]  ;;  %v4576_v9 = vld [vmem:[#allocation10 + $0xb4] sm:$0xf] }
 0x121   :  { %2537 = vmatpush.bf16.msra.mxu0 %v4005_v15  ;;  %v4555_v15 = vld [vmem:[#allocation10 + $0x4] sm:$0xf0]  ;;  %v4598_v8 = vld [vmem:[#allocation10 + $0x164] sm:$0xf] }
 0x122   :  { %2100 = vmatmul.bf16.vlgmr.msrb.gmra.mxu1 %v4955_v40  ;;  %2113 = vmatmul.bf16.vlgmr.msrb.gmra.mxu2 %v4949_v34  ;;  %v3981_v40 = vor.u32 %v4563_v35, %v3980_v37  ;;  %v1880_v34 = vpop.f32.mrf.mxu0 }
 0x123   :  { %2550 = vmatpush.bf16.msra.mxu1 %v4069_v18  ;;  %2126 = vmatmul.bf16.vlgmr.msrb.gmra.mxu3 %v4953_v38  ;;  %v4561_v38 = vld [vmem:[#allocation10 + $0x34] sm:$0xf0]  ;;  %v1881_v45 = vadd.f32 %v1880_v34, %v1868_v31  ;;  %v4012_v18 = vld [vmem:[#allocation10 + $0x80] sm:$0xf]  ;;  %v3949_v31 = vor.u32 %v4555_v15, %v3948_v11  ;;  %v4129_v11 = vor.u32 %v4598_v8, %v4126_v10  ;;  %v4558_v15 = vld [vmem:[#allocation10 + $0x24] sm:$0xf] }
 0x124   :  { %2563 = vmatpush.bf16.msra.mxu2 %v4133_v41  ;;  %v3973_v52 = vor.u32 %v4561_v38, %v3972_v43  ;;  %v4013_v37 = vor.u32 %v4571_v19, %v4012_v18  ;;  %v4582_v41 = vld [vmem:[#allocation10 + $0xe4] sm:$0xf]  ;;  %v4092_v34 = vld [vmem:[#allocation10 + $0x120] sm:$0xf]  ;;  %v3966_v18 = vld [vmem:[#allocation10 + $0x28] sm:$0xf0] }
 0x125   :  { %2538 = vmatpush.bf16.msra.mxu0 %v3997_v6  ;;  %v1894_v50 = vadd.f32 %v1893_v46, %v1881_v45  ;;  %v1906_v57 = vpop.f32.mrf.mxu2  ;;  %v4006_v6 = vld [vmem:[#allocation10 + $0x78] sm:$0xf0]  ;;  %v4001_v45 = vor.u32 %v4566_v1, %v3998_v39  ;;  %v4084_v46 = vld [vmem:[#allocation10 + $0x110] sm:$0xf]  ;;  %v4574_v19 = vld [vmem:[#allocation10 + $0xa4] sm:$0xf] }
 0x126   :  { %v4009_v35 = vor.u32 %v4568_v23, %v4006_v6  ;;  %v4596_v23 = vld [vmem:[#allocation10 + $0x154] sm:$0xf]  ;;  %v4118_v6 = vld [vmem:[#allocation10 + $0x158] sm:$0xf0]  ;;  %v4180_v8 = vld [vmem:[#allocation10 + $0x1d0] sm:$0xf] }
 0x127   :  { %2551 = vmatpush.bf16.msra.mxu1 %v4061_v24  ;;  %v1907_v59 = vadd.f32 %v1906_v57, %v1894_v50  ;;  %v1895_v7 = vpop.f32.mrf.mxu1  ;;  %v4580_v50 = vld [vmem:[#allocation10 + $0xd4] sm:$0xf]  ;;  %v3993_v57 = vor.u32 %v4564_v47, %v3990_v49  ;;  %v4590_v49 = vld [vmem:[#allocation10 + $0x124] sm:$0xf]  ;;  %v4613_v10 = vld [vmem:[#allocation10 + $0x1d4] sm:$0xf0] }
 0x128   :  { %2564 = vmatpush.bf16.msra.mxu2 %v4125_v51  ;;  %v1919_v60 = vpop.f32.mrf.mxu3  ;;  %v4085_v51 = vor.u32 %v4589_v33, %v4084_v46  ;;  %v4592_v46 = vld [vmem:[#allocation10 + $0x134] sm:$0xf]  ;;  %v4102_v33 = vld [vmem:[#allocation10 + $0x138] sm:$0xf0] }
 0x129   :  { %2539 = vmatpush.bf16.msra.mxu0 %v3989_v30  ;;  %v1920_v4 = vadd.f32 %v1919_v60, %v1907_v59  ;;  %v4101_v30 = vor.u32 %v4593_v27, %v4100_v26  ;;  %v4562_v59 = vld [vmem:[#allocation10 + $0x44] sm:$0xf]  ;;  %v3982_v60 = vld [vmem:[#allocation10 + $0x48] sm:$0xf0]  ;;  %v4556_v27 = vld [vmem:[#allocation10 + $0x14] sm:$0xf]  ;;  %v4105_v47 = vor.u32 %v4592_v46, %v4102_v33 }
 0x12a   :  { %v1882_v2 = vpop.f32.mrf.mxu0  ;;  %v3961_v36 = vor.u32 %v4556_v27, %v3958_v13  ;;  %v4156_v27 = vld [vmem:[#allocation10 + $0x1a0] sm:$0xf]  ;;  %v4607_v13 = vld [vmem:[#allocation10 + $0x1a4] sm:$0xf0] }
 0x12b   :  { %2552 = vmatpush.bf16.msra.mxu1 %v4053_v32  ;;  %v2136_v21 = vmul.f32 0.01, %v1920_v4  ;;  %vm2132_vm0 = vcmp.gt.f32.partialorder %v1920_v4, 0.0  ;;  %v3985_v2 = vor.u32 %v4562_v59, %v3982_v60  ;;  %v4086_v59 = vld [vmem:[#allocation10 + $0x118] sm:$0xf0] }
 0x12c   :  { %2565 = vmatpush.bf16.msra.mxu2 %v4117_v63  ;;  %v4046_v63 = vld [vmem:[#allocation10 + $0xc8] sm:$0xf0] }
 0x12d   :  { %2540 = vmatpush.bf16.msra.mxu0 %v3981_v40  ;;  %v1908_v24 = vpop.f32.mrf.mxu2  ;;  %v2140_v32 = vsel %vm2132_vm0, %v1920_v4, %v2136_v21  ;;  %v4062_v40 = vld [vmem:[#allocation10 + $0xe8] sm:$0xf0]  ;;  %v4560_v4 = vld [vmem:[#allocation10 + $0x34] sm:$0xf] }
 0x12e   :  { %v5012_v43 = vpack.c.bf16 %v2140_v32, %v2140_v32  ;;  %v4065_v48 = vor.u32 %v4582_v41, %v4062_v40  ;;  %v3977_v12 = vor.u32 %v4560_v4, %v3974_v5  ;;  %v3969_v24 = vor.u32 %v4558_v15, %v3966_v18  ;;  %v4554_v40 = vld [vmem:[#allocation10 + $0x4] sm:$0xf]  ;;  %v4188_v4 = vld [vmem:[#allocation10 + $0x1e0] sm:$0xf]  ;;  %v4615_v5 = vld [vmem:[#allocation10 + $0x1e4] sm:$0xf0] }
 0x12f   :  { %2553 = vmatpush.bf16.msra.mxu1 %v4045_v42  ;;  %v4591_v42 = vld [vmem:[#allocation10 + $0x124] sm:$0xf0] }
 0x130   :  { %v1921_v25 = vpop.f32.mrf.mxu3  ;;  %2566 = vmatpush.bf16.msra.mxu2 %v4109_v20  ;;  %v4093_v38 = vor.u32 %v4591_v42, %v4092_v34  ;;  %v4030_v20 = vld [vmem:[#allocation10 + $0xa8] sm:$0xf0]  ;;  %v4570_v42 = vld [vmem:[#allocation10 + $0x84] sm:$0xf]  ;;  %v4611_v18 = vld [vmem:[#allocation10 + $0x1c4] sm:$0xf0] }
 0x131   :  { %2541 = vmatpush.bf16.msra.mxu0 %v3973_v52  ;;  %v4054_v52 = vld [vmem:[#allocation10 + $0xd8] sm:$0xf0]  ;;  %v4121_v25 = vor.u32 %v4596_v23, %v4118_v6  ;;  %v4033_v26 = vor.u32 %v4574_v19, %v4030_v20  ;;  %v3950_v34 = vld [vmem:[#allocation10 + $0x8] sm:$0xf0]  ;;  %v4164_v20 = vld [vmem:[#allocation10 + $0x1b0] sm:$0xf] }
 0x132   :  { %v4057_v58 = vor.u32 %v4580_v50, %v4054_v52  ;;  %v4094_v50 = vld [vmem:[#allocation10 + $0x128] sm:$0xf0]  ;;  %v3953_v52 = vor.u32 %v4554_v40, %v3950_v34  ;;  %v4616_v40 = vld [vmem:[#allocation10 + $0x1f4] sm:$0xf]  ;;  %v4198_v34 = vld [vmem:[#allocation10 + $0x1f8] sm:$0xf0] }
 0x133   :  { %2554 = vmatpush.bf16.msra.mxu1 %v4037_v53  ;;  %v4076_v53 = vld [vmem:[#allocation10 + $0x100] sm:$0xf] }
 0x134   :  { %2567 = vmatpush.bf16.msra.mxu2 %v4101_v30  ;;  %v4077_v61 = vor.u32 %v4587_v54, %v4076_v53  ;;  %v4572_v30 = vld [vmem:[#allocation10 + $0x94] sm:$0xf]  ;;  %v4196_v53 = vld [vmem:[#allocation10 + $0x1f0] sm:$0xf] }
 0x135   :  { %2542 = vmatpush.bf16.msra.mxu0 %v3965_v0  ;;  %v4137_v0 = vor.u32 %v4600_v55, %v4134_v56  ;;  %v4617_v55 = vld [vmem:[#allocation10 + $0x1f4] sm:$0xf0]  ;;  %v4097_v56 = vor.u32 %v4590_v49, %v4094_v50  ;;  %v4182_v49 = vld [vmem:[#allocation10 + $0x1d8] sm:$0xf0] }
 0x137   :  { %2555 = vmatpush.bf16.msra.mxu1 %v4029_v3  ;;  %v4049_v3 = vor.u32 %v4578_v62, %v4046_v63  ;;  %v4586_v62 = vld [vmem:[#allocation10 + $0x104] sm:$0xf]  ;;  %v4078_v63 = vld [vmem:[#allocation10 + $0x108] sm:$0xf0] }
 0x138   :  { %2568 = vmatpush.bf16.msra.mxu2 %v4093_v38  ;;  %v4014_v38 = vld [vmem:[#allocation10 + $0x88] sm:$0xf0] }
 0x139   :  { %2543 = vmatpush.bf16.msra.mxu0 %v3957_v14  ;;  %v4041_v14 = vor.u32 %v4576_v9, %v4038_v16  ;;  %v4017_v54 = vor.u32 %v4570_v42, %v4014_v38  ;;  %v4201_v42 = vor.u32 %v4616_v40, %v4198_v34  ;;  %v4614_v38 = vld [vmem:[#allocation10 + $0x1e4] sm:$0xf] }
 0x13b   :  { %2556 = vmatpush.bf16.msra.mxu1 %v4021_v22 }
 0x13c   :  { %2569 = vmatpush.bf16.msra.mxu2 %v4085_v51 }
 0x13d   :  { %2544 = vmatpush.bf16.msra.mxu0 %v3949_v31  ;;  %v1932_v7 = vpop.f32.mrf.mxu0  ;;  %v4022_v31 = vld [vmem:[#allocation10 + $0x98] sm:$0xf0] }
 0x13e   :  { %v4025_v41 = vor.u32 %v4572_v30, %v4022_v31 }
 0x13f   :  { %2557 = vmatpush.bf16.msra.mxu1 %v4013_v37  ;;  %v5018_v17 = vpop.f32.mrf.mxu1  ;;  %v4594_v37 = vld [vmem:[#allocation10 + $0x144] sm:$0xf] }
 0x140   :  { %2545 = vmatmul.bf16.vlgmr.msra.gmra.mxu0 %v5014_v44  ;;  %2570 = vmatpush.bf16.msra.mxu2 %v4077_v61 }
 0x141   :  { %2589 = vmatpush.bf16.msrb.mxu0 %v4009_v35  ;;  %v4110_v35 = vld [vmem:[#allocation10 + $0x148] sm:$0xf0] }
 0x142   :  { %2558 = vmatmul.bf16.vlgmr.msra.gmra.mxu1 %v5012_v43  ;;  %v4113_v39 = vor.u32 %v4594_v37, %v4110_v35  ;;  %v4148_v37 = vld [vmem:[#allocation10 + $0x190] sm:$0xf]  ;;  %v4605_v35 = vld [vmem:[#allocation10 + $0x194] sm:$0xf0] }
 0x143   :  { %2602 = vmatpush.bf16.msrb.mxu1 %v4073_v28  ;;  %v5023_v28 = vld [vmem:[%s5050_s4] sm:$0xf] }
 0x144   :  { %2615 = vmatpush.bf16.msrb.mxu2 %v4137_v0  ;;  %v429_v1 = vperm.slane %v5023_v28, 2 }
 0x145   :  { %2590 = vmatpush.bf16.msrb.mxu0 %v4001_v45  ;;  %v1958_v21 = vpop.f32.mrf.mxu2  ;;  %v1934_v29 = vpop.f32.mrf.mxu0 }
 0x146   :  { %v1933_v51 = vadd.f32 %v1932_v7, %v429_v1  ;;  %v4189_v7 = vor.u32 %v4615_v5, %v4188_v4  ;;  %v4140_v1 = vld [vmem:[#allocation10 + $0x180] sm:$0xf]  ;;  %v4604_v5 = vld [vmem:[#allocation10 + $0x194] sm:$0xf] }
 0x147   :  { %2603 = vmatpush.bf16.msrb.mxu1 %v4065_v48  ;;  %v1947_v32 = vpop.f32.mrf.mxu1 }
 0x148   :  { %2616 = vmatpush.bf16.msrb.mxu2 %v4129_v11  ;;  %v1971_v22 = vpop.f32.mrf.mxu3  ;;  %v1946_v60 = vadd.f32 %v5018_v17, %v1933_v51  ;;  %v4181_v11 = vor.u32 %v4613_v10, %v4180_v8  ;;  %v4157_v32 = vor.u32 %v4607_v13, %v4156_v27  ;;  %v4602_v8 = vld [vmem:[#allocation10 + $0x184] sm:$0xf]  ;;  %v4142_v10 = vld [vmem:[#allocation10 + $0x188] sm:$0xf0]  ;;  %v2211_v27 = vld [vmem:[%s5052_s6] sm:$0x3] }
 0x149   :  { %2591 = vmatpush.bf16.msrb.mxu0 %v3993_v57  ;;  %v4197_v57 = vor.u32 %v4617_v55, %v4196_v53  ;;  %v4174_v55 = vld [vmem:[#allocation10 + $0x1c8] sm:$0xf0]  ;;  %v2213_v13 = vperm.slane %v2211_v27, 0 }
 0x14a   :  { %v1959_v0 = vadd.f32 %v1958_v21, %v1946_v60  ;;  %v4609_v21 = vld [vmem:[#allocation10 + $0x1b4] sm:$0xf0]  ;;  %v4166_v60 = vld [vmem:[#allocation10 + $0x1b8] sm:$0xf0] }
 0x14b   :  { %2604 = vmatpush.bf16.msrb.mxu1 %v4057_v58  ;;  %v4588_v58 = vld [vmem:[#allocation10 + $0x114] sm:$0xf]  ;;  %2576 = vmatpush.bf16.msra.mxu3 %v4197_v57 }
 0x14c   :  { %2617 = vmatpush.bf16.msrb.mxu2 %v4121_v25  ;;  %v4089_v61 = vor.u32 %v4588_v58, %v4086_v59  ;;  %v4165_v25 = vor.u32 %v4609_v21, %v4164_v20  ;;  %v430_v58 = vperm.slane %v5023_v28, 3  ;;  %v4608_v59 = vld [vmem:[#allocation10 + $0x1b4] sm:$0xf]  ;;  %v4145_v28 = vor.u32 %v4602_v8, %v4142_v10 }
 0x14d   :  { %2592 = vmatpush.bf16.msrb.mxu0 %v3985_v2  ;;  %v1960_v45 = vpop.f32.mrf.mxu2  ;;  %v4081_v2 = vor.u32 %v4586_v62, %v4078_v63  ;;  %v4169_v62 = vor.u32 %v4608_v59, %v4166_v60  ;;  %v4606_v63 = vld [vmem:[#allocation10 + $0x1a4] sm:$0xf]  ;;  %v4629_v59 = vld [vmem:[#allocation12 + $0x58] sm:$0xff]  ;;  %v4628_v60 = vld [vmem:[#allocation12 + $0x50] sm:$0xff] }
 0x14e   :  { %v4190_v45 = vld [vmem:[#allocation10 + $0x1e8] sm:$0xf0] }
 0x14f   :  { %2605 = vmatpush.bf16.msrb.mxu1 %v4049_v3  ;;  %v1972_v3 = vadd.f32 %v1971_v22, %v1959_v0  ;;  %2577 = vmatpush.bf16.msra.mxu3 %v4189_v7  ;;  %v4193_v33 = vor.u32 %v4614_v38, %v4190_v45  ;;  %v4158_v0 = vld [vmem:[#allocation10 + $0x1a8] sm:$0xf0]  ;;  %v4625_v38 = vld [vmem:[#allocation12 + $0x38] sm:$0xff] }
 0x150   :  { %2618 = vmatpush.bf16.msrb.mxu2 %v4113_v39  ;;  %v1973_v48 = vpop.f32.mrf.mxu3  ;;  %v4603_v39 = vld [vmem:[#allocation10 + $0x184] sm:$0xf0]  ;;  %v4633_v45 = vld [vmem:[#allocation12 + $0x78] sm:$0xff] }
 0x151   :  { %2593 = vmatpush.bf16.msrb.mxu0 %v3977_v12 }
 0x153   :  { %2606 = vmatpush.bf16.msrb.mxu1 %v4041_v14  ;;  %2578 = vmatpush.bf16.msra.mxu3 %v4181_v11 }
 0x154   :  { %2619 = vmatpush.bf16.msrb.mxu2 %v4105_v47  ;;  %v4612_v47 = vld [vmem:[#allocation10 + $0x1d4] sm:$0xf] }
 0x155   :  { %2594 = vmatpush.bf16.msrb.mxu0 %v3969_v24  ;;  %v4185_v51 = vor.u32 %v4612_v47, %v4182_v49  ;;  %v4622_v49 = vld [vmem:[#allocation12 + $0x20] sm:$0xff] }
 0x157   :  { %2607 = vmatpush.bf16.msrb.mxu1 %v4033_v26 }
 0x158   :  { %2620 = vmatpush.bf16.msrb.mxu2 %v4097_v56 }
 0x159   :  { %2595 = vmatpush.bf16.msrb.mxu0 %v3961_v36  ;;  %v4149_v36 = vor.u32 %v4605_v35, %v4148_v37 }
 0x15b   :  { %2608 = vmatpush.bf16.msrb.mxu1 %v4025_v41  ;;  %v4141_v41 = vor.u32 %v4603_v39, %v4140_v1 }
 0x15c   :  { %2621 = vmatpush.bf16.msrb.mxu2 %v4089_v61 }
 0x15d   :  { %2596 = vmatpush.bf16.msrb.mxu0 %v3953_v52  ;;  %v1984_v9 = vpop.f32.mrf.mxu0 }
 0x15e   :  { %v1985_v16 = vadd.f32 %v1984_v9, %v1972_v3  ;;  %v4161_v3 = vor.u32 %v4606_v63, %v4158_v0  ;;  %v4150_v9 = vld [vmem:[#allocation10 + $0x198] sm:$0xf0]  ;;  %v4640_v0 = vld [vmem:[#allocation13 + $0x30] sm:$0xff] }
 0x15f   :  { %2609 = vmatpush.bf16.msrb.mxu1 %v4017_v54  ;;  %v1997_v17 = vpop.f32.mrf.mxu1  ;;  %v4610_v54 = vld [vmem:[#allocation10 + $0x1c4] sm:$0xf]  ;;  %v4153_v7 = vor.u32 %v4604_v5, %v4150_v9  ;;  %v4641_v63 = vld [vmem:[#allocation13 + $0x38] sm:$0xff] }
 0x160   :  { %2597 = vmatmul.bf16.vlgmr.msrb.gmra.mxu0 %v5014_v44  ;;  %2622 = vmatpush.bf16.msrb.mxu2 %v4081_v2  ;;  %v1998_v44 = vadd.f32 %v1997_v17, %v1985_v16  ;;  %v4177_v57 = vor.u32 %v4610_v54, %v4174_v55  ;;  %v4619_v55 = vld [vmem:[#allocation12 + $0x8] sm:$0xff] }
 0x161   :  { %2781 = vmatpush.bf16.msra.mxu0 %v4625_v38 }
 0x162   :  { %2610 = vmatmul.bf16.vlgmr.msrb.gmra.mxu1 %v5012_v43  ;;  %v4172_v43 = vld [vmem:[#allocation10 + $0x1c0] sm:$0xf] }
 0x163   :  { %v4173_v19 = vor.u32 %v4611_v18, %v4172_v43  ;;  %2794 = vmatpush.bf16.msra.mxu1 %v4633_v45 }
 0x165   :  { %v2010_v12 = vpop.f32.mrf.mxu2  ;;  %v1986_v23 = vpop.f32.mrf.mxu0  ;;  %2579 = vmatpush.bf16.msra.mxu3 %v4173_v19 }
 0x166   :  { %v2011_v14 = vadd.f32 %v2010_v12, %v1998_v44 }
 0x167   :  { %v1999_v6 = vpop.f32.mrf.mxu1 }
 0x168   :  { %v2023_v15 = vpop.f32.mrf.mxu3 }
 0x169   :  { %v2024_v22 = vadd.f32 %v2023_v15, %v2011_v14  ;;  %2580 = vmatpush.bf16.msra.mxu3 %v4165_v25 }
 0x16b   :  { %vm2133_vm2 = vcmp.gt.f32.partialorder %v2024_v22, 0.0  ;;  %v2137_v24 = vmul.f32 0.01, %v2024_v22 }
 0x16d   :  { %v2141_v26 = vsel %vm2133_vm2, %v2024_v22, %v2137_v24  ;;  %v2012_v30 = vpop.f32.mrf.mxu2  ;;  %2581 = vmatpush.bf16.msra.mxu3 %v4157_v32 }
 0x16e   :  { %v2145_v29 = vpack.c.bf16 %v2141_v26, %v2141_v26 }
 0x170   :  { %v2025_v31 = vpop.f32.mrf.mxu3  ;;  %2571 = vmatmul.bf16.vlgmr.msra.gmra.mxu2 %v2145_v29 }
 0x171   :  { %2582 = vmatpush.bf16.msra.mxu3 %v4149_v36  ;;  %v2214_v36 = vperm.slane %v2211_v27, 1  ;;  %2879 = vmatpush.bf16.msra.mxu2 %v4641_v63  ;;  %v4666_v27 = vld [vmem:[#allocation4 + $0x38] sm:$0xff] }
 0x172   :  { %vm143_vm13 = vcmp.ne.f32.partialorder %v4666_v27, %v4666_v27 }
 0x175   :  { %2583 = vmatpush.bf16.msra.mxu3 %v4141_v41  ;;  %2880 = vmatpush.bf16.msra.mxu2 %v4640_v0 }
 0x179   :  { %2628 = vmatpush.bf16.msrb.mxu3 %v4201_v42 }
 0x17d   :  { %v2036_v46 = vpop.f32.mrf.mxu0  ;;  %2629 = vmatpush.bf16.msrb.mxu3 %v4193_v33  ;;  %v4632_v33 = vld [vmem:[#allocation12 + $0x70] sm:$0xff] }
 0x17e   :  { %v2037_v4 = vadd.f32 %v2036_v46, %v430_v58  ;;  %v4624_v46 = vld [vmem:[#allocation12 + $0x30] sm:$0xff]  ;;  %2795 = vmatpush.bf16.msra.mxu1 %v4632_v33  ;;  %v4630_v58 = vld [vmem:[#allocation12 + $0x60] sm:$0xff] }
 0x17f   :  { %v2049_v48 = vpop.f32.mrf.mxu1  ;;  %2782 = vmatpush.bf16.msra.mxu0 %v4624_v46 }
 0x180   :  { %2623 = vmatmul.bf16.vlgmr.msrb.gmra.mxu2 %v2145_v29  ;;  %v2050_v16 = vadd.f32 %v2049_v48, %v2037_v4  ;;  %v4623_v48 = vld [vmem:[#allocation12 + $0x28] sm:$0xff] }
 0x181   :  { %2630 = vmatpush.bf16.msrb.mxu3 %v4185_v51 }
 0x183   :  { %2783 = vmatpush.bf16.msra.mxu0 %v4623_v48  ;;  %v4656_v48 = vld [vmem:[%s5054_s8] ss:$0 sm:$0xff]  ;;  %s4858_s8 = smov [#allocation15]  }
 0x184   :  { %s2907_s17 = sshll.u32 %s4858_s8, 4  ;;  %s2908_s17 = int_to_ptr.vmem [resolvable:$true] %s2907_s17 }
 0x185   :  { %v2062_v50 = vpop.f32.mrf.mxu2  ;;  %v2038_v53 = vpop.f32.mrf.mxu0  ;;  %2631 = vmatpush.bf16.msrb.mxu3 %v4177_v57  ;;  %v4618_v57 = vld [vmem:[#allocation12] sm:$0xff] }
 0x186   :  { %v2063_v17 = vadd.f32 %v2062_v50, %v2050_v16  ;;  %v4621_v50 = vld [vmem:[#allocation12 + $0x18] sm:$0xff] }
 0x187   :  { %v2051_v56 = vpop.f32.mrf.mxu1  ;;  %2784 = vmatpush.bf16.msra.mxu0 %v4622_v49 }
 0x188   :  { %v2075_v52 = vpop.f32.mrf.mxu3  ;;  %v4631_v56 = vld [vmem:[#allocation12 + $0x68] sm:$0xff] }
 0x189   :  { %2632 = vmatpush.bf16.msrb.mxu3 %v4169_v62  ;;  %v2076_v11 = vadd.f32 %v2075_v52, %v2063_v17  ;;  %v4620_v52 = vld [vmem:[#allocation12 + $0x10] sm:$0xff]  ;;  %2796 = vmatpush.bf16.msra.mxu1 %v4631_v56  ;;  %v4626_v62 = vld [vmem:[#allocation12 + $0x40] sm:$0xff] }
 0x18b   :  { %2785 = vmatpush.bf16.msra.mxu0 %v4621_v50 }
 0x18d   :  { %v2064_v61 = vpop.f32.mrf.mxu2  ;;  %2633 = vmatpush.bf16.msrb.mxu3 %v4161_v3  ;;  %2797 = vmatpush.bf16.msra.mxu1 %v4630_v58  ;;  %v2895_v58 = vstv %s5046_s0 }
 0x18e   :  { %v4627_v61 = vld [vmem:[#allocation12 + $0x48] sm:$0xff] }
 0x18f   :  { %2786 = vmatpush.bf16.msra.mxu0 %v4620_v52 }
 0x190   :  { %v2077_v2 = vpop.f32.mrf.mxu3 }
 0x191   :  { %2634 = vmatpush.bf16.msrb.mxu3 %v4153_v7  ;;  %2798 = vmatpush.bf16.msra.mxu1 %v4629_v59 }
 0x193   :  { %2787 = vmatpush.bf16.msra.mxu0 %v4619_v55  ;;  %v2893_v55 = vlaneseq }
 0x195   :  { %2635 = vmatpush.bf16.msrb.mxu3 %v4145_v28  ;;  %2799 = vmatpush.bf16.msra.mxu1 %v4628_v60  ;;  %v2894_v56 = vand.u32 127, %v2893_v55  ;;  %v2897_v60 = vld [vmem:[#allocation7] sm:$0xff] }
 0x197   :  { %2788 = vmatpush.bf16.msra.mxu0 %v4618_v57  ;;  %v4657_v57 = vld [vmem:[%s5056_s10] ss:$0 sm:$0xff]  ;;  %vm2896_vm15 = vcmp.lt.s32.totalorder %v2894_v56, %v2895_v58  ;;  %vm2899_vm0 = vcmp.eq.s32.totalorder %v2894_v56, 7 }
 0x199   :  { %2800 = vmatpush.bf16.msra.mxu1 %v4627_v61 }
 0x19d   :  { %v2088_v44 = vpop.f32.mrf.mxu0  ;;  %2801 = vmatpush.bf16.msra.mxu1 %v4626_v62 }
 0x19e   :  { %v2089_v14 = vadd.f32 %v2088_v44, %v2076_v11 }
 0x19f   :  { %v2101_v12 = vpop.f32.mrf.mxu1 }
 0x1a0   :  { %v2102_v15 = vadd.f32 %v2101_v12, %v2089_v14  ;;  %v4639_v14 = vld [vmem:[#allocation13 + $0x28] sm:$0xff] }
 0x1a1   :  { %2881 = vmatpush.bf16.msra.mxu2 %v4639_v14 }
 0x1a5   :  { %v2114_v43 = vpop.f32.mrf.mxu2  ;;  %v2090_v20 = vpop.f32.mrf.mxu0 }
 0x1a6   :  { %v2115_v18 = vadd.f32 %v2114_v43, %v2102_v15  ;;  %v2127_v19 = vpop.f32.mrf.mxu3  ;;  %v4638_v15 = vld [vmem:[#allocation13 + $0x20] sm:$0xff]  ;;  %v4637_v43 = vld [vmem:[#allocation13 + $0x18] sm:$0xff] }
 0x1a7   :  { %v2103_v21 = vpop.f32.mrf.mxu1  ;;  %2882 = vmatpush.bf16.msra.mxu2 %v4638_v15  ;;  %v4634_v20 = vld [vmem:[#allocation13] sm:$0xff] }
 0x1a8   :  { %v2128_v22 = vadd.f32 %v2127_v19, %v2115_v18  ;;  %v4636_v18 = vld [vmem:[#allocation13 + $0x10] sm:$0xff]  ;;  %v4635_v19 = vld [vmem:[#allocation13 + $0x8] sm:$0xff]  ;;  %v4659_v21 = vld [vmem:[#allocation4] sm:$0xff] }
 0x1a9   :  { %vm136_vm6 = vcmp.ne.f32.partialorder %v4659_v21, %v4659_v21 }
 0x1aa   :  { %vm2134_vm3 = vcmp.gt.f32.partialorder %v2128_v22, 0.0  ;;  %v2138_v23 = vmul.f32 0.01, %v2128_v22 }
 0x1ab   :  { %2883 = vmatpush.bf16.msra.mxu2 %v4637_v43 }
 0x1ac   :  { %v2142_v6 = vsel %vm2134_vm3, %v2128_v22, %v2138_v23  ;;  %v4660_v22 = vld [vmem:[#allocation4 + $0x8] sm:$0xff]  ;;  %v4661_v23 = vld [vmem:[#allocation4 + $0x10] sm:$0xff] }
 0x1ad   :  { %v2146_v24 = vpack.c.bf16 %v2142_v6, %v2142_v6  ;;  %v2116_v25 = vpop.f32.mrf.mxu2  ;;  %vm137_vm7 = vcmp.ne.f32.partialorder %v4660_v22, %v4660_v22  ;;  %vm138_vm8 = vcmp.ne.f32.partialorder %v4661_v23, %v4661_v23  ;;  %v4662_v6 = vld [vmem:[#allocation4 + $0x18] sm:$0xff] }
 0x1ae   :  { %v2129_v26 = vpop.f32.mrf.mxu3  ;;  %vm139_vm9 = vcmp.ne.f32.partialorder %v4662_v6, %v4662_v6  ;;  %v4664_v25 = vld [vmem:[#allocation4 + $0x28] sm:$0xff] }
 0x1af   :  { %2584 = vmatmul.bf16.vlgmr.msra.gmra.mxu3 %v2146_v24  ;;  %2884 = vmatpush.bf16.msra.mxu2 %v4636_v18  ;;  %vm141_vm11 = vcmp.ne.f32.partialorder %v4664_v25, %v4664_v25  ;;  %v4665_v26 = vld [vmem:[#allocation4 + $0x30] sm:$0xff] }
 0x1b0   :  { %vm142_vm12 = vcmp.ne.f32.partialorder %v4665_v26, %v4665_v26 }
 0x1b3   :  { %2885 = vmatpush.bf16.msra.mxu2 %v4635_v19 }
 0x1b7   :  { %2886 = vmatpush.bf16.msra.mxu2 %v4634_v20 }
 0x1bd   :  { %v2546_v29 = vpop.f32.mrf.mxu0 }
 0x1be   :  { %v2547_v30 = vadd.f32 %v2546_v29, %v2213_v13  ;;  %v4857_v13 = vmov 0.0  }
 0x1bf   :  { %v2559_v31 = vpop.f32.mrf.mxu1  ;;  %2636 = vmatmul.bf16.vlgmr.msrb.gmra.mxu3 %v2146_v24  ;;  %v4663_v24 = vld [vmem:[#allocation4 + $0x20] sm:$0xff]  ;;  %v144_v29 = vsel %vm136_vm6, 1.0, %v4857_v13 }
 0x1c0   :  { %v2560_v32 = vadd.f32 %v2559_v31, %v2547_v30  ;;  %vm140_vm10 = vcmp.ne.f32.partialorder %v4663_v24, %v4663_v24  ;;  %v145_v30 = vsel %vm137_vm7, 1.0, %v4857_v13  ;;  %v146_v31 = vsel %vm138_vm8, 1.0, %v4857_v13 }
 0x1c5   :  { %v2548_v37 = vpop.f32.mrf.mxu0 }
 0x1c6   :  { %v148_v37 = vsel %vm140_vm10, 1.0, %v4857_v13 }
 0x1c7   :  { %v2561_v35 = vpop.f32.mrf.mxu1 }
 0x1c8   :  { %v149_v35 = vsel %vm141_vm11, 1.0, %v4857_v13 }
 0x1dd   :  { %v2598_v1 = vpop.f32.mrf.mxu0 }
 0x1de   :  { %v2599_v39 = vadd.f32 %v2598_v1, %v2214_v36  ;;  %v150_v36 = vsel %vm142_vm12, 1.0, %v4857_v13  ;;  %v151_v1 = vsel %vm143_vm13, 1.0, %v4857_v13 }
 0x1df   :  { %v2611_v41 = vpop.f32.mrf.mxu1 }
 0x1e0   :  { %v2612_v40 = vadd.f32 %v2611_v41, %v2599_v39  ;;  %v152_v39 = vmax.f32 %v144_v29, %v148_v37  ;;  %v153_v41 = vmax.f32 %v145_v30, %v149_v35 }
 0x1e5   :  { %v2600_v34 = vpop.f32.mrf.mxu0 }
 0x1e7   :  { %v2613_v42 = vpop.f32.mrf.mxu1 }
 0x1e8   :  { %v156_v42 = vmax.f32 %v152_v39, %v153_v41 }
 0x1f3   :  { %v2572_v47 = vpop.f32.mrf.mxu2 }
 0x1f4   :  { %v2573_v2 = vadd.f32 %v2572_v47, %v2560_v32  ;;  %v147_v32 = vsel %vm139_vm9, 1.0, %v4857_v13 }
 0x1f5   :  { %v155_v34 = vmax.f32 %v147_v32, %v151_v1 }
 0x1fb   :  { %v2574_v51 = vpop.f32.mrf.mxu2 }
 0x203   :  { %v2624_v53 = vpop.f32.mrf.mxu2 }
 0x204   :  { %v2625_v17 = vadd.f32 %v2624_v53, %v2612_v40  ;;  %v154_v40 = vmax.f32 %v146_v31, %v150_v36 }
 0x206   :  { %v157_v38 = vmax.f32 %v154_v40, %v155_v34 }
 0x208   :  { %v158_v46 = vmax.f32 %v156_v42, %v157_v38 }
 0x20a   :  { %159 = vmax.xlane.f32.xlu0 %v158_v46 }
 0x20b   :  { %v2626_v54 = vpop.f32.mrf.mxu2 }
 0x232   :  { %v2585_v3 = vpop.f32.mrf.mxu3 }
 0x233   :  { %v2586_v4 = vadd.f32 %v2585_v3, %v2573_v2 }
 0x235   :  { %vm2641_vm4 = vcmp.gt.f32.partialorder %v2586_v4, 0.0  ;;  %v2643_v5 = vmul.f32 0.01, %v2586_v4 }
 0x237   :  { %v2645_v9 = vsel %vm2641_vm4, %v2586_v4, %v2643_v5 }
 0x238   :  { %v2647_v7 = vpack.c.bf16 %v2645_v9, %v2645_v9 }
 0x23a   :  { %v2587_v16 = vpop.f32.mrf.mxu3  ;;  %2789 = vmatmul.bf16.vlgmr.msra.gmra.mxu0 %v2647_v7 }
 0x242   :  { %v2637_v8 = vpop.f32.mrf.mxu3 }
 0x243   :  { %v2638_v10 = vadd.f32 %v2637_v8, %v2625_v17 }
 0x245   :  { %vm2642_vm5 = vcmp.gt.f32.partialorder %v2638_v10, 0.0  ;;  %v2644_v28 = vmul.f32 0.01, %v2638_v10 }
 0x247   :  { %v2646_v11 = vsel %vm2642_vm5, %v2638_v10, %v2644_v28 }
 0x248   :  { %v2648_v44 = vpack.c.bf16 %v2646_v11, %v2646_v11 }
 0x24a   :  { %v2639_v12 = vpop.f32.mrf.mxu3  ;;  %2802 = vmatmul.bf16.vlgmr.msra.gmra.mxu1 %v2648_v44 }
 0x27d   :  { %v160_v62 = vpop.xlane.xlu0 %159 }
 0x2b7   :  { %v2790_v45 = vpop.f32.mrf.mxu0 }
 0x2b8   :  { %v2791_v47 = vadd.f32 %v4656_v48, %v2790_v45 }
 0x2bf   :  { %v2792_v33 = vpop.f32.mrf.mxu0 }
 0x2c7   :  { %v2803_v49 = vpop.f32.mrf.mxu1 }
 0x2c8   :  { %v2804_v50 = vadd.f32 %v2803_v49, %v2791_v47 }
 0x2ca   :  { %vm2807_vm14 = vcmp.gt.f32.partialorder %v2804_v50, 0.0  ;;  %v2808_v51 = vmul.f32 0.01, %v2804_v50 }
 0x2cc   :  { %v2809_v52 = vsel %vm2807_vm14, %v2804_v50, %v2808_v51 }
 0x2cd   :  { %v2810_v53 = vpack.c.bf16 %v2809_v52, %v2809_v52 }
 0x2cf   :  { %v2805_v54 = vpop.f32.mrf.mxu1  ;;  %2887 = vmatmul.bf16.vlgmr.msra.gmra.mxu2 %v2810_v53 }
 0x352   :  { %v2888_v59 = vpop.f32.mrf.mxu2 }
 0x353   :  { %v2889_v61 = vadd.f32 %v4657_v57, %v2888_v59 }
 0x355   :  { %v2898_v63 = vsel %vm2896_vm15, %v2897_v60, %v2889_v61 }
 0x356   :  { %v2900_v0 = vsel %vm2899_vm0, %v160_v62, %v2898_v63 }
 0x357   :  { %2901 = vst [vmem:[#allocation15] sm:$0xff] %v2900_v0 }
 0x358   :  { %2912 = dma.vmem_to_hbm [thread:$0]  %s2908_s17, 128, %s2910_s20, [#allocation6]  }
 0x35a   :  { %v2890_v2 = vpop.f32.mrf.mxu2 }
 0x35b   :  { %4843 = dma.done.wait [#allocation6], 128  }
 0x35c   :  { %4844 = vsyncadd [#allocation6], 4294967168 }
 0x35d   :  { %2917 = vsyncpa [#allocation5], 1 }
 0x35e   :  { %2918 = vsyncpa [#allocation8], 1 }
 0x35f   :  { %2919 = vsyncpa [#allocation11], 1 }
 0x360   :  { %2920 = vsyncpa [#allocation14], 1 }
 0x361   :  { %2921 = vsyncpa [#allocation6], 1 }

</bundles_post_ra>
